<compile_context>
chip_gen: v7x
topology: tpu7x:2x2x1
jax: 0.10.0
libtpu: 0.0.40
codegen_flags: <defaults>
</compile_context>

<pallas_src>
import functools

import jax
import jax.numpy as jnp
from jax.experimental import pallas as pl
from jax.experimental.pallas import tpu as pltpu


# --------------------------------------------------------------------------
# Sizing helpers (TPU-generation aware).
# --------------------------------------------------------------------------
def _round_up(x, m):
    return ((x + m - 1) // m) * m


def _tpu_vmem_bytes():
    """Physical VMEM per TensorCore (128 MiB v5e/v6e, 64 MiB v7x)."""
    try:
        return int(pltpu.get_tpu_info().vmem_capacity_bytes)
    except Exception:
        return 128 * 1024 * 1024


def _vmem_limit_bytes():
    return int(min(_tpu_vmem_bytes() * 3 // 4, 100 * 1024 * 1024))


def _choose_tiling(E, bytes_per_col, budget, t_max=2048):
    """Pick the lane-dense edge tile size.

    First find the largest power-of-two multiple of 128 (<= t_max) whose
    streamed VMEM footprint fits `budget`, then re-derive the tile from the
    tile COUNT so total edge padding stays small (review: E=2250 used to pad
    to 4096; now pads to 2304)."""
    t = t_max
    while t > 128 and t * bytes_per_col > budget:
        t //= 2
    e128 = _round_up(max(E, 1), 128)
    t = min(t, e128)
    n = -(-e128 // t)
    t_e = _round_up(-(-E // n), 128)
    return t_e, n * t_e, n


def _edge_tiling_for(E, cin_list, cout, feature_dtype, instance_norm=True):
    """Shared edge tiling so a previous conv's padded output can be passed
    straight through as the next conv's self-tap operand (no re-pad/slice)."""
    feature_dtype = jnp.dtype(feature_dtype)
    align = 16 if feature_dtype.itemsize < 4 else 8
    c_pads = [_round_up(int(c), align) for c in cin_list]
    cout_pad = _round_up(int(cout), align)
    fb = feature_dtype.itemsize
    vmem_limit = _vmem_limit_bytes()
    fixed = sum(5 * cp * cout_pad for cp in c_pads) * fb * 2 + (2 << 20)
    col = (sum(5 * cp for cp in c_pads) * fb * 2
           + cout_pad * (4 if instance_norm else fb) * 2)
    t_e, e_pad, _ = _choose_tiling(E, col, max(vmem_limit - fixed, 4 << 20))
    return t_e, e_pad


# --------------------------------------------------------------------------
# XLA-side input preparation (gather of taps 1-4, symmetric functions, pads).
# --------------------------------------------------------------------------
def _prep_self(x, E, e_pad, c_true, c_pad, dtype):
    """Self-tap (tap 0) operand: zero-padded (B, c_pad, e_pad) view of x.
    A previous mesh_conv's padded output is passed through untouched."""
    B, C, Ex = x.shape
    if C == c_pad and Ex == e_pad and x.dtype == jnp.dtype(dtype):
        return x
    x = x[:, :c_true, :E].astype(dtype)
    return jnp.pad(x, ((0, 0), (0, c_pad - c_true), (0, e_pad - E)))


def _build_sym_slab(x, gemm, E, e_pad, c_true, c_pad, dtype):
    """Gather the four 1-ring neighbour taps and apply the order-invariant
    symmetric functions in the XLA stage (review: Pallas body stays pure
    matmul).  Returns the K-major slab (B, 4*c_pad, e_pad) laid out as
    [f1+f3 ; f2+f4 ; |f1-f3| ; |f2-f4|] along the channel (sublane) axis.

    TODO(synk): a row-major (B, E, C) gather + one transpose may lower better
    in XLA:TPU than this minor-axis take_along_axis; profile for large E.
    """
    B = x.shape[0]
    xg = x[:, :c_true, :].astype(dtype)
    idx = jnp.where(gemm >= 0, gemm, 0).astype(jnp.int32)        # (B, E, 4)
    valid = gemm >= 0                                            # -1 == boundary
    taps = []
    for k in range(4):
        ik = jnp.broadcast_to(idx[:, None, :, k], (B, c_true, E))
        t = jnp.take_along_axis(xg, ik, axis=2)                  # (B, c_true, E)
        taps.append(jnp.where(valid[:, None, :, k], t, jnp.zeros((), dtype)))
    f1, f2, f3, f4 = taps
    sym = jnp.stack([f1 + f3, f2 + f4, jnp.abs(f1 - f3), jnp.abs(f2 - f4)],
                    axis=1)                                      # (B, 4, C, E)
    sym = jnp.pad(sym, ((0, 0), (0, 0), (0, c_pad - c_true), (0, e_pad - E)))
    return sym.reshape(B, 4 * c_pad, e_pad)


def _prep_weights(w, cout_pad, c_pad, dtype):
    """w: (5, Cout, Cin) tap-major -> (w_self (cout_pad, c_pad),
    w_sym (cout_pad, 4*c_pad)) zero padded to sublane-aligned segments."""
    _, cout, cin = w.shape
    w = jnp.pad(w, ((0, 0), (0, cout_pad - cout), (0, c_pad - cin)))
    w_self = w[0].astype(dtype)
    w_sym = jnp.transpose(w[1:], (1, 0, 2)).reshape(cout_pad, 4 * c_pad)
    return w_self, w_sym.astype(dtype)


# --------------------------------------------------------------------------
# Pallas kernels.
# --------------------------------------------------------------------------
def _conv_kernel(*refs, n_in, e_real, e_tile, leaky, mode):
    # refs = x_0..x_{n-1} (1,c_pad_i,tE), slab_0.. (1,4*c_pad_i,tE),
    #        wA_0.. (Cp,c_pad_i), wB_0.. (Cp,4*c_pad_i), bias (Cp,1),
    #        outputs..., scratch...
    x_refs = refs[0:n_in]
    s_refs = refs[n_in:2 * n_in]
    wa_refs = refs[2 * n_in:3 * n_in]
    wb_refs = refs[3 * n_in:4 * n_in]
    b_ref = refs[4 * n_in]
    rest = refs[4 * n_in + 1:]

    acc = None
    for x_ref, s_ref, wa_ref, wb_ref in zip(x_refs, s_refs, wa_refs, wb_refs):
        p = jnp.dot(wa_ref[...], x_ref[0], preferred_element_type=jnp.float32)
        p = p + jnp.dot(wb_ref[...], s_ref[0], preferred_element_type=jnp.float32)
        acc = p if acc is None else acc + p
    y = acc + b_ref[...]                                         # (Cp, tE) f32
    if leaky is not None:
        y = jnp.maximum(y, 0.0) if leaky == 0.0 else jnp.where(y >= 0, y, leaky * y)

    if mode == "plain":
        o_ref = rest[0]
        o_ref[0] = y.astype(o_ref.dtype)
        return

    if mode == "resident":
        o_ref, sum_ref, ssq_ref = rest
    else:  # "stats" (streamed instance norm)
        o_ref, mean_ref, rstd_ref, sum_ref, ssq_ref = rest

    ei = pl.program_id(1)

    @pl.when(ei == 0)
    def _():
        sum_ref[...] = jnp.zeros_like(sum_ref)
        ssq_ref[...] = jnp.zeros_like(ssq_ref)

    off = pl.multiple_of(ei * e_tile, 128)
    col = jax.lax.broadcasted_iota(jnp.int32, (1, e_tile), 1) + off
    y_m = jnp.where(col < e_real, y, 0.0)                        # mask padded edges
    # TODO(synk): E[x^2]-E[x]^2 can cancel for large |mean|; use a shifted /
    # two-pass accumulation if activations are not roughly centered.
    sum_ref[...] += jnp.sum(y_m, axis=1, keepdims=True)
    ssq_ref[...] += jnp.sum(y_m * y_m, axis=1, keepdims=True)

    if mode == "resident":
        o_ref[0, :, pl.ds(off, e_tile)] = y

        @pl.when(ei == pl.num_programs(1) - 1)
        def _():
            inv_n = 1.0 / float(e_real)
            mean = sum_ref[...] * inv_n
            var = ssq_ref[...] * inv_n - mean * mean
            o_ref[0] = (o_ref[0] - mean) * jax.lax.rsqrt(var + 1e-5)
    else:
        o_ref[0] = y

        @pl.when(ei == pl.num_programs(1) - 1)
        def _():
            inv_n = 1.0 / float(e_real)
            mean = sum_ref[...] * inv_n
            var = ssq_ref[...] * inv_n - mean * mean
            mean_ref[0] = mean
            rstd_ref[0] = jax.lax.rsqrt(var + 1e-5)


def _norm_kernel(y_ref, mean_ref, rstd_ref, o_ref):
    o_ref[0] = ((y_ref[0] - mean_ref[0]) * rstd_ref[0]).astype(o_ref.dtype)


def _apply_instance_norm(y, mean, rstd, t_e, vmem_limit):
    """Fully-parallel streamed normalize pass (second half of the two-pass
    instance norm used when the resident scheme would not fit VMEM)."""
    B, cp, e_pad = y.shape
    n_et = e_pad // t_e
    return pl.pallas_call(
        _norm_kernel,
        out_shape=jax.ShapeDtypeStruct((B, cp, e_pad), jnp.float32),
        grid_spec=pltpu.PrefetchScalarGridSpec(
            num_scalar_prefetch=0,
            grid=(B, n_et),
            in_specs=[pl.BlockSpec((1, cp, t_e), lambda bi, ei: (bi, 0, ei)),
                      pl.BlockSpec((1, cp, 1), lambda bi, ei: (bi, 0, 0)),
                      pl.BlockSpec((1, cp, 1), lambda bi, ei: (bi, 0, 0))],
            out_specs=pl.BlockSpec((1, cp, t_e), lambda bi, ei: (bi, 0, ei))),
        compiler_params=pltpu.CompilerParams(
            dimension_semantics=("parallel", "parallel"),
            vmem_limit_bytes=vmem_limit),
    )(y, mean, rstd)


# --------------------------------------------------------------------------
# MeshConv wrapper (optionally fused with leaky-ReLU + InstanceNorm2d).
# --------------------------------------------------------------------------
def mesh_conv(xs, gemm_edges, ws, b, *, leaky=None, instance_norm=False,
              feature_dtype=jnp.bfloat16, out_dtype=None, norm_mode="auto",
              edge_tiling=None):
    """Fused MeshConv over one or more channel groups (skip-concat fused).

    xs : list of (B, C_i, E') edge features, C_i >= Cin_i (extra channels are
         zero padding from a previous mesh_conv), E' >= E.
    ws : list of (5, Cout, Cin_i) tap-major weights;  b : (Cout, 1) bias.
    Returns a channel/edge padded (B, Cout_pad, e_pad) array; real data lives
    in [:, :Cout, :E].
    """
    xs, ws = list(xs), list(ws)
    n_in = len(xs)
    B = xs[0].shape[0]
    E = int(gemm_edges.shape[1])
    Cout = int(ws[0].shape[1])

    feature_dtype = jnp.dtype(feature_dtype)
    if instance_norm:
        out_dtype = jnp.dtype(jnp.float32)
    else:
        out_dtype = jnp.dtype(out_dtype) if out_dtype is not None else feature_dtype

    align = 16 if feature_dtype.itemsize < 4 else 8
    c_trues = [int(w.shape[2]) for w in ws]
    c_pads = [_round_up(c, align) for c in c_trues]
    cout_pad = _round_up(Cout, align)
    fb = feature_dtype.itemsize

    vmem_limit = _vmem_limit_bytes()
    fixed = sum(5 * cp * cout_pad for cp in c_pads) * fb * 2 + (2 << 20)
    col_in = sum(5 * cp for cp in c_pads) * fb * 2

    if edge_tiling is None:
        t_e, e_pad = _edge_tiling_for(E, c_trues, Cout, feature_dtype, instance_norm)
    else:
        t_e, e_pad = edge_tiling
    n_et = e_pad // t_e

    use_resident = False
    if instance_norm:
        resident = cout_pad * e_pad * 4 * 2            # f32, double-buffer margin
        fits = fixed + resident + col_in * t_e <= int(vmem_limit * 0.85)
        use_resident = norm_mode == "resident" or (norm_mode == "auto" and fits)

    # ---- XLA-side prep: self-tap passthrough + gathered symmetric-tap slab.
    x_selfs = [_prep_self(x, E, e_pad, ct, cp, feature_dtype)
               for x, ct, cp in zip(xs, c_trues, c_pads)]
    slabs = [_build_sym_slab(x, gemm_edges, E, e_pad, ct, cp, feature_dtype)
             for x, ct, cp in zip(xs, c_trues, c_pads)]
    w_pairs = [_prep_weights(w, cout_pad, cp, feature_dtype)
               for w, cp in zip(ws, c_pads)]
    w_selfs = [p[0] for p in w_pairs]
    w_syms = [p[1] for p in w_pairs]
    bias = jnp.pad(b.astype(jnp.float32), ((0, cout_pad - b.shape[0]), (0, 0)))

    # TODO(synk): on v5e, sweep pipeline_mode=pl.Buffered(3) on the slab specs
    # once bf16 halves the per-tile footprint (exposed DMA latency).
    in_specs = [pl.BlockSpec((1, cp, t_e), lambda bi, ei: (bi, 0, ei))
                for cp in c_pads]
    in_specs += [pl.BlockSpec((1, 4 * cp, t_e), lambda bi, ei: (bi, 0, ei))
                 for cp in c_pads]
    in_specs += [pl.BlockSpec((cout_pad, cp), lambda bi, ei: (0, 0))
                 for cp in c_pads]
    in_specs += [pl.BlockSpec((cout_pad, 4 * cp), lambda bi, ei: (0, 0))
                 for cp in c_pads]
    in_specs.append(pl.BlockSpec((cout_pad, 1), lambda bi, ei: (0, 0)))
    inputs = (*x_selfs, *slabs, *w_selfs, *w_syms, bias)

    if not instance_norm:
        mode = "plain"
        out_shape = jax.ShapeDtypeStruct((B, cout_pad, e_pad), out_dtype)
        out_specs = pl.BlockSpec((1, cout_pad, t_e), lambda bi, ei: (bi, 0, ei))
        scratch = []
        dims = ("parallel", "parallel")
    elif use_resident:
        mode = "resident"
        out_shape = jax.ShapeDtypeStruct((B, cout_pad, e_pad), jnp.float32)
        out_specs = pl.BlockSpec((1, cout_pad, e_pad), lambda bi, ei: (bi, 0, 0))
        scratch = [pltpu.VMEM((cout_pad, 1), jnp.float32),
                   pltpu.VMEM((cout_pad, 1), jnp.float32)]
        # TODO(synk): for B==1 on v7x both TensorCores could share the E-axis
        # stats reduction (per-core partial sums + CMEM combine); currently the
        # reduction axis is "arbitrary" and runs on one core.
        dims = ("parallel", "arbitrary")
    else:
        mode = "stats"
        out_shape = (jax.ShapeDtypeStruct((B, cout_pad, e_pad), jnp.float32),
                     jax.ShapeDtypeStruct((B, cout_pad, 1), jnp.float32),
                     jax.ShapeDtypeStruct((B, cout_pad, 1), jnp.float32))
        out_specs = (pl.BlockSpec((1, cout_pad, t_e), lambda bi, ei: (bi, 0, ei)),
                     pl.BlockSpec((1, cout_pad, 1), lambda bi, ei: (bi, 0, 0)),
                     pl.BlockSpec((1, cout_pad, 1), lambda bi, ei: (bi, 0, 0)))
        scratch = [pltpu.VMEM((cout_pad, 1), jnp.float32),
                   pltpu.VMEM((cout_pad, 1), jnp.float32)]
        dims = ("parallel", "arbitrary")

    kernel = functools.partial(_conv_kernel, n_in=n_in, e_real=E, e_tile=t_e,
                               leaky=leaky, mode=mode)
    out = pl.pallas_call(
        kernel,
        out_shape=out_shape,
        grid_spec=pltpu.PrefetchScalarGridSpec(
            num_scalar_prefetch=0,
            grid=(B, n_et),
            in_specs=in_specs,
            out_specs=out_specs,
            scratch_shapes=scratch),
        compiler_params=pltpu.CompilerParams(
            dimension_semantics=dims,
            vmem_limit_bytes=vmem_limit),
    )(*inputs)

    if mode != "stats":
        return out
    y_raw, mean, rstd = out
    return _apply_instance_norm(y_raw, mean, rstd, t_e, vmem_limit)


# --------------------------------------------------------------------------
# UpConv forward (blocks=0, unroll=0, residual=True, batch_norm=True,
# transfer_data=True, leaky=0).
# --------------------------------------------------------------------------
def up_conv_forward(from_up, from_down, gemm_edges, params, *, leaky=0.0,
                    feature_dtype=jnp.bfloat16, norm_mode="auto"):
    """UpConv(in_ch, out_ch).forward((from_up, meshes), from_down).

    gemm_edges: (B, E, 4) int32 one-ring neighbour indices (-1 == boundary).
    TODO(synk): meshes with edges_count < E (pad_gemm rows) are not modelled;
    the driver assumes full meshes.
    """
    _, _, E = from_up.shape
    Cout = int(params["w1"].shape[1])
    # One shared edge tiling so conv1's padded bf16 output feeds conv2's
    # self-tap operand directly (no trailing slice / re-pad between convs).
    tiling = _edge_tiling_for(E, [Cout, Cout], Cout, feature_dtype, True)

    # up_conv = ConvBlock(in, out) == one MeshConv (no activation); output kept
    # channel/edge padded and in feature_dtype for the next conv's gather.
    x1 = mesh_conv([from_up], gemm_edges, [params["w1"]], params["b1"],
                   feature_dtype=feature_dtype, out_dtype=feature_dtype,
                   edge_tiling=tiling)
    # TODO(synk): MeshUnpool (unroll > 0) path not implemented (default unroll=0).

    # transfer_data: channel concat fused by splitting conv1's weight;
    # conv1 + F.leaky_relu + InstanceNorm2d fused into one Pallas kernel.
    w2a = params["w2"][:, :, :Cout]
    w2b = params["w2"][:, :, Cout:]
    y = mesh_conv([x1, from_down], gemm_edges, [w2a, w2b], params["b2"],
                  leaky=leaky, instance_norm=True, feature_dtype=feature_dtype,
                  norm_mode=norm_mode, edge_tiling=tiling)
    # blocks == 0 -> no residual conv2 stack; squeeze(3) is implicit in layout.
    return y[:, :Cout, :E]


# --------------------------------------------------------------------------
# Pure-JAX reference (for correctness checking of the Pallas path).
# --------------------------------------------------------------------------
def up_conv_reference(from_up, from_down, gemm_edges, params, leaky=0.0):
    def conv_ref(x, w, b):
        B, C, E = x.shape
        idx = jnp.where(gemm_edges >= 0, gemm_edges, 0).astype(jnp.int32)
        valid = gemm_edges >= 0
        taps = [x]
        for k in range(4):
            ik = jnp.broadcast_to(idx[:, None, :, k], (B, C, E))
            t = jnp.take_along_axis(x, ik, axis=2)
            taps.append(jnp.where(valid[:, None, :, k], t, 0.0))
        f0, f1, f2, f3, f4 = taps
        sym = [f0, f1 + f3, f2 + f4, jnp.abs(f1 - f3), jnp.abs(f2 - f4)]
        y = sum(jnp.einsum("oc,bce->boe", w[k], sym[k],
                           precision=jax.lax.Precision.HIGHEST)
                for k in range(5))
        return y + b[None]

    x1 = conv_ref(from_up, params["w1"], params["b1"])
    x = jnp.concatenate([x1, from_down], axis=1)
    y = conv_ref(x, params["w2"], params["b2"])
    y = jnp.where(y >= 0, y, leaky * y)
    mean = jnp.mean(y, axis=2, keepdims=True)
    var = jnp.mean((y - mean) ** 2, axis=2, keepdims=True)
    return (y - mean) * jax.lax.rsqrt(var + 1e-5)


if __name__ == "__main__":
    key = jax.random.PRNGKey(0)
    B, Cin, Cout, E = 2, 4, 8, 16
    k_up, k_down, k_g, k_w1, k_b1, k_w2, k_b2 = jax.random.split(key, 7)

    from_up = jax.random.normal(k_up, (B, Cin, E), jnp.float32)
    from_down = jax.random.normal(k_down, (B, Cout, E), jnp.float32)
    # synthetic mesh: 4 one-ring neighbour indices per edge (mesh.gemm_edges)
    gemm_edges = jax.random.randint(k_g, (B, E, 4), 0, E, jnp.int32)

    params = {
        # MeshConv(in, out): Conv2d weight (Cout, Cin, 1, 5) stored tap-major
        # as (5, Cout, Cin); bias (Cout, 1)
        "w1": 0.1 * jax.random.normal(k_w1, (5, Cout, Cin), jnp.float32),
        "b1": 0.1 * jax.random.normal(k_b1, (Cout, 1), jnp.float32),
        # MeshConv(2*out, out)
        "w2": 0.1 * jax.random.normal(k_w2, (5, Cout, 2 * Cout), jnp.float32),
        "b2": 0.1 * jax.random.normal(k_b2, (Cout, 1), jnp.float32),
    }

    ref = up_conv_reference(from_up, from_down, gemm_edges, params, leaky=0.0)

    run_f32_res = jax.jit(functools.partial(
        up_conv_forward, leaky=0.0, feature_dtype=jnp.float32,
        norm_mode="resident"))
    run_f32_str = jax.jit(functools.partial(
        up_conv_forward, leaky=0.0, feature_dtype=jnp.float32,
        norm_mode="streamed"))
    run_bf16 = jax.jit(functools.partial(up_conv_forward, leaky=0.0))

    out_res = run_f32_res(from_up, from_down, gemm_edges, params)
    out_str = run_f32_str(from_up, from_down, gemm_edges, params)
    out_bf16 = run_bf16(from_up, from_down, gemm_edges, params)
    jax.block_until_ready((out_res, out_str, out_bf16))

    assert out_res.shape == (B, Cout, E) and out_res.dtype == jnp.float32
    assert out_str.shape == (B, Cout, E) and out_str.dtype == jnp.float32
    assert out_bf16.shape == (B, Cout, E) and out_bf16.dtype == jnp.float32
    assert jnp.allclose(out_res, ref, atol=5e-2, rtol=5e-2), \
        float(jnp.max(jnp.abs(out_res - ref)))
    assert jnp.allclose(out_str, ref, atol=5e-2, rtol=5e-2), \
        float(jnp.max(jnp.abs(out_str - ref)))
    assert float(jnp.max(jnp.abs(out_bf16 - ref))) < 0.3
    print("KERNEL_OK")
</pallas_src>

<mosaic_0001>
module attributes {stable_mosaic.version = 11 : i64} {
  func.func @_conv_kernel(%arg0: i32, %arg1: i32, %arg2: memref<1x8x128xf32, #tpu.memory_space<vmem>>, %arg3: memref<1x32x128xf32, #tpu.memory_space<vmem>>, %arg4: memref<8x8xf32, #tpu.memory_space<vmem>>, %arg5: memref<8x32xf32, #tpu.memory_space<vmem>>, %arg6: memref<8x1xf32, #tpu.memory_space<vmem>>, %arg7: memref<1x8x128xf32, #tpu.memory_space<vmem>>) attributes {dimension_semantics = [#tpu.dimension_semantics<parallel>, #tpu.dimension_semantics<parallel>], iteration_bounds = array<i64: 2, 1>, scalar_prefetch = 0 : i64, scratch_operands = 0 : i64, tpu.core_type = #tpu.core_type<tc>, window_params = [{transform_indices = @transform_0, window_bounds = array<i64: 1, 8, 128>}, {transform_indices = @transform_1, window_bounds = array<i64: 1, 32, 128>}, {pipeline_mode = #tpu.pipeline_mode<synchronous>, transform_indices = @transform_2, window_bounds = array<i64: 8, 8>}, {pipeline_mode = #tpu.pipeline_mode<synchronous>, transform_indices = @transform_3, window_bounds = array<i64: 8, 32>}, {pipeline_mode = #tpu.pipeline_mode<synchronous>, transform_indices = @transform_4, window_bounds = array<i64: 8, 1>}, {transform_indices = @transform_5, window_bounds = array<i64: 1, 8, 128>}]} {
    %c0 = arith.constant 0 : index
    %c0_0 = arith.constant 0 : index
    %0 = vector.load %arg4[%c0, %c0_0] : memref<8x8xf32, #tpu.memory_space<vmem>>, vector<8x8xf32>
    %c0_1 = arith.constant 0 : index
    %c0_2 = arith.constant 0 : index
    %c0_3 = arith.constant 0 : index
    %1 = vector.load %arg2[%c0_1, %c0_2, %c0_3] : memref<1x8x128xf32, #tpu.memory_space<vmem>>, vector<1x8x128xf32>
    %2 = vector.shape_cast %1 : vector<1x8x128xf32> to vector<8x128xf32>
    %cst = arith.constant dense<0.000000e+00> : vector<8x128xf32>
    %3 = tpu.matmul %0, %2, %cst {dimension_numbers = #tpu.dot_dimension_numbers<[1], [0], [0], [1], [0, 0, 1, 1], [], []>} : vector<8x8xf32>, vector<8x128xf32>, vector<8x128xf32> -> vector<8x128xf32>
    %c0_4 = arith.constant 0 : index
    %c0_5 = arith.constant 0 : index
    %4 = vector.load %arg5[%c0_4, %c0_5] : memref<8x32xf32, #tpu.memory_space<vmem>>, vector<8x32xf32>
    %c0_6 = arith.constant 0 : index
    %c0_7 = arith.constant 0 : index
    %c0_8 = arith.constant 0 : index
    %5 = vector.load %arg3[%c0_6, %c0_7, %c0_8] : memref<1x32x128xf32, #tpu.memory_space<vmem>>, vector<1x32x128xf32>
    %6 = vector.shape_cast %5 : vector<1x32x128xf32> to vector<32x128xf32>
    %cst_9 = arith.constant dense<0.000000e+00> : vector<8x128xf32>
    %7 = tpu.matmul %4, %6, %cst_9 {dimension_numbers = #tpu.dot_dimension_numbers<[1], [0], [0], [1], [0, 0, 1, 1], [], []>} : vector<8x32xf32>, vector<32x128xf32>, vector<8x128xf32> -> vector<8x128xf32>
    %8 = arith.addf %3, %7 : vector<8x128xf32>
    %c0_10 = arith.constant 0 : index
    %c0_11 = arith.constant 0 : index
    %9 = vector.load %arg6[%c0_10, %c0_11] : memref<8x1xf32, #tpu.memory_space<vmem>>, vector<8x1xf32>
    %10 = vector.broadcast %9 : vector<8x1xf32> to vector<8x128xf32>
    %11 = arith.addf %8, %10 : vector<8x128xf32>
    %c0_12 = arith.constant 0 : index
    %c0_13 = arith.constant 0 : index
    %c0_14 = arith.constant 0 : index
    %12 = vector.load %arg7[%c0_12, %c0_13, %c0_14] : memref<1x8x128xf32, #tpu.memory_space<vmem>>, vector<1x8x128xf32>
    %13 = vector.shape_cast %12 : vector<1x8x128xf32> to vector<8x128xf32>
    %14 = vector.shape_cast %11 : vector<8x128xf32> to vector<1x8x128xf32>
    tpu.vector_store %arg7[%c0_12, %c0_13, %c0_14], %14 {strides = array<i32>} : memref<1x8x128xf32, #tpu.memory_space<vmem>>, vector<1x8x128xf32>,
    return
  }
  func.func @transform_0(%arg0: i32, %arg1: i32) -> (i32, i32, i32) {
    %c0_i32 = arith.constant 0 : i32
    %c0_i32_0 = arith.constant 0 : i32
    return %arg0, %c0_i32, %arg1 : i32, i32, i32
  }
  func.func @transform_1(%arg0: i32, %arg1: i32) -> (i32, i32, i32) {
    %c0_i32 = arith.constant 0 : i32
    %c0_i32_0 = arith.constant 0 : i32
    return %arg0, %c0_i32, %arg1 : i32, i32, i32
  }
  func.func @transform_2(%arg0: i32, %arg1: i32) -> (i32, i32) {
    %c0_i32 = arith.constant 0 : i32
    %c0_i32_0 = arith.constant 0 : i32
    %c0_i32_1 = arith.constant 0 : i32
    return %c0_i32, %c0_i32_0 : i32, i32
  }
  func.func @transform_3(%arg0: i32, %arg1: i32) -> (i32, i32) {
    %c0_i32 = arith.constant 0 : i32
    %c0_i32_0 = arith.constant 0 : i32
    %c0_i32_1 = arith.constant 0 : i32
    return %c0_i32, %c0_i32_0 : i32, i32
  }
  func.func @transform_4(%arg0: i32, %arg1: i32) -> (i32, i32) {
    %c0_i32 = arith.constant 0 : i32
    %c0_i32_0 = arith.constant 0 : i32
    %c0_i32_1 = arith.constant 0 : i32
    return %c0_i32, %c0_i32_0 : i32, i32
  }
  func.func @transform_5(%arg0: i32, %arg1: i32) -> (i32, i32, i32) {
    %c0_i32 = arith.constant 0 : i32
    %c0_i32_0 = arith.constant 0 : i32
    return %arg0, %c0_i32, %arg1 : i32, i32, i32
  }
}

module attributes {stable_mosaic.version = 11 : i64} {
  func.func @_conv_kernel(%arg0: i32, %arg1: i32, %arg2: memref<1x8x128xf32, #tpu.memory_space<vmem>>, %arg3: memref<1x8x128xf32, #tpu.memory_space<vmem>>, %arg4: memref<1x32x128xf32, #tpu.memory_space<vmem>>, %arg5: memref<1x32x128xf32, #tpu.memory_space<vmem>>, %arg6: memref<8x8xf32, #tpu.memory_space<vmem>>, %arg7: memref<8x8xf32, #tpu.memory_space<vmem>>, %arg8: memref<8x32xf32, #tpu.memory_space<vmem>>, %arg9: memref<8x32xf32, #tpu.memory_space<vmem>>, %arg10: memref<8x1xf32, #tpu.memory_space<vmem>>, %arg11: memref<1x8x128xf32, #tpu.memory_space<vmem>>, %arg12: memref<8x1xf32, #tpu.memory_space<vmem>>, %arg13: memref<8x1xf32, #tpu.memory_space<vmem>>) attributes {dimension_semantics = [#tpu.dimension_semantics<parallel>, #tpu.dimension_semantics<arbitrary>], iteration_bounds = array<i64: 2, 1>, scalar_prefetch = 0 : i64, scratch_operands = 2 : i64, tpu.core_type = #tpu.core_type<tc>, window_params = [{transform_indices = @transform_0, window_bounds = array<i64: 1, 8, 128>}, {transform_indices = @transform_1, window_bounds = array<i64: 1, 8, 128>}, {transform_indices = @transform_2, window_bounds = array<i64: 1, 32, 128>}, {transform_indices = @transform_3, window_bounds = array<i64: 1, 32, 128>}, {pipeline_mode = #tpu.pipeline_mode<synchronous>, transform_indices = @transform_4, window_bounds = array<i64: 8, 8>}, {pipeline_mode = #tpu.pipeline_mode<synchronous>, transform_indices = @transform_5, window_bounds = array<i64: 8, 8>}, {pipeline_mode = #tpu.pipeline_mode<synchronous>, transform_indices = @transform_6, window_bounds = array<i64: 8, 32>}, {pipeline_mode = #tpu.pipeline_mode<synchronous>, transform_indices = @transform_7, window_bounds = array<i64: 8, 32>}, {pipeline_mode = #tpu.pipeline_mode<synchronous>, transform_indices = @transform_8, window_bounds = array<i64: 8, 1>}, {transform_indices = @transform_9, window_bounds = array<i64: 1, 8, 128>}]} {
    %c0 = arith.constant 0 : index
    %c0_0 = arith.constant 0 : index
    %0 = vector.load %arg6[%c0, %c0_0] : memref<8x8xf32, #tpu.memory_space<vmem>>, vector<8x8xf32>
    %c0_1 = arith.constant 0 : index
    %c0_2 = arith.constant 0 : index
    %c0_3 = arith.constant 0 : index
    %1 = vector.load %arg2[%c0_1, %c0_2, %c0_3] : memref<1x8x128xf32, #tpu.memory_space<vmem>>, vector<1x8x128xf32>
    %2 = vector.shape_cast %1 : vector<1x8x128xf32> to vector<8x128xf32>
    %cst = arith.constant dense<0.000000e+00> : vector<8x128xf32>
    %3 = tpu.matmul %0, %2, %cst {dimension_numbers = #tpu.dot_dimension_numbers<[1], [0], [0], [1], [0, 0, 1, 1], [], []>} : vector<8x8xf32>, vector<8x128xf32>, vector<8x128xf32> -> vector<8x128xf32>
    %c0_4 = arith.constant 0 : index
    %c0_5 = arith.constant 0 : index
    %4 = vector.load %arg8[%c0_4, %c0_5] : memref<8x32xf32, #tpu.memory_space<vmem>>, vector<8x32xf32>
    %c0_6 = arith.constant 0 : index
    %c0_7 = arith.constant 0 : index
    %c0_8 = arith.constant 0 : index
    %5 = vector.load %arg4[%c0_6, %c0_7, %c0_8] : memref<1x32x128xf32, #tpu.memory_space<vmem>>, vector<1x32x128xf32>
    %6 = vector.shape_cast %5 : vector<1x32x128xf32> to vector<32x128xf32>
    %cst_9 = arith.constant dense<0.000000e+00> : vector<8x128xf32>
    %7 = tpu.matmul %4, %6, %cst_9 {dimension_numbers = #tpu.dot_dimension_numbers<[1], [0], [0], [1], [0, 0, 1, 1], [], []>} : vector<8x32xf32>, vector<32x128xf32>, vector<8x128xf32> -> vector<8x128xf32>
    %8 = arith.addf %3, %7 : vector<8x128xf32>
    %c0_10 = arith.constant 0 : index
    %c0_11 = arith.constant 0 : index
    %9 = vector.load %arg7[%c0_10, %c0_11] : memref<8x8xf32, #tpu.memory_space<vmem>>, vector<8x8xf32>
    %c0_12 = arith.constant 0 : index
    %c0_13 = arith.constant 0 : index
    %c0_14 = arith.constant 0 : index
    %10 = vector.load %arg3[%c0_12, %c0_13, %c0_14] : memref<1x8x128xf32, #tpu.memory_space<vmem>>, vector<1x8x128xf32>
    %11 = vector.shape_cast %10 : vector<1x8x128xf32> to vector<8x128xf32>
    %cst_15 = arith.constant dense<0.000000e+00> : vector<8x128xf32>
    %12 = tpu.matmul %9, %11, %cst_15 {dimension_numbers = #tpu.dot_dimension_numbers<[1], [0], [0], [1], [0, 0, 1, 1], [], []>} : vector<8x8xf32>, vector<8x128xf32>, vector<8x128xf32> -> vector<8x128xf32>
    %c0_16 = arith.constant 0 : index
    %c0_17 = arith.constant 0 : index
    %13 = vector.load %arg9[%c0_16, %c0_17] : memref<8x32xf32, #tpu.memory_space<vmem>>, vector<8x32xf32>
    %c0_18 = arith.constant 0 : index
    %c0_19 = arith.constant 0 : index
    %c0_20 = arith.constant 0 : index
    %14 = vector.load %arg5[%c0_18, %c0_19, %c0_20] : memref<1x32x128xf32, #tpu.memory_space<vmem>>, vector<1x32x128xf32>
    %15 = vector.shape_cast %14 : vector<1x32x128xf32> to vector<32x128xf32>
    %cst_21 = arith.constant dense<0.000000e+00> : vector<8x128xf32>
    %16 = tpu.matmul %13, %15, %cst_21 {dimension_numbers = #tpu.dot_dimension_numbers<[1], [0], [0], [1], [0, 0, 1, 1], [], []>} : vector<8x32xf32>, vector<32x128xf32>, vector<8x128xf32> -> vector<8x128xf32>
    %17 = arith.addf %12, %16 : vector<8x128xf32>
    %18 = arith.addf %8, %17 : vector<8x128xf32>
    %c0_22 = arith.constant 0 : index
    %c0_23 = arith.constant 0 : index
    %19 = vector.load %arg10[%c0_22, %c0_23] : memref<8x1xf32, #tpu.memory_space<vmem>>, vector<8x1xf32>
    %20 = vector.broadcast %19 : vector<8x1xf32> to vector<8x128xf32>
    %21 = arith.addf %18, %20 : vector<8x128xf32>
    %cst_24 = arith.constant 0.000000e+00 : f32
    %22 = vector.broadcast %cst_24 : f32 to vector<8x128xf32>
    %23 = arith.maximumf %21, %22 : vector<8x128xf32>
    %c0_i32 = arith.constant 0 : i32
    %24 = arith.cmpi eq, %arg1, %c0_i32 : i32
    %25 = arith.extui %24 : i1 to i32
    %c0_i32_25 = arith.constant 0 : i32
    %26 = arith.cmpi ne, %25, %c0_i32_25 : i32
    scf.if %26 {
      %cst_41 = arith.constant 0.000000e+00 : f32
      %56 = vector.broadcast %cst_41 : f32 to vector<8x1xf32>
      %c0_42 = arith.constant 0 : index
      %c0_43 = arith.constant 0 : index
      %57 = vector.load %arg12[%c0_42, %c0_43] : memref<8x1xf32, #tpu.memory_space<vmem>>, vector<8x1xf32>
      tpu.vector_store %arg12[%c0_42, %c0_43], %56 {strides = array<i32>} : memref<8x1xf32, #tpu.memory_space<vmem>>, vector<8x1xf32>,
      %cst_44 = arith.constant 0.000000e+00 : f32
      %58 = vector.broadcast %cst_44 : f32 to vector<8x1xf32>
      %c0_45 = arith.constant 0 : index
      %c0_46 = arith.constant 0 : index
      %59 = vector.load %arg13[%c0_45, %c0_46] : memref<8x1xf32, #tpu.memory_space<vmem>>, vector<8x1xf32>
      tpu.vector_store %arg13[%c0_45, %c0_46], %58 {strides = array<i32>} : memref<8x1xf32, #tpu.memory_space<vmem>>, vector<8x1xf32>,
    } else {
    }
    %c128_i32 = arith.constant 128 : i32
    %27 = arith.muli %arg1, %c128_i32 : i32
    %28 = tpu.assume_multiple %27, 128 : i32
    %29 = tpu.iota {dimensions = array<i32: 1>} : vector<1x128xi32>
    %30 = vector.broadcast %28 : i32 to vector<1x128xi32>
    %31 = arith.addi %29, %30 : vector<1x128xi32>
    %c16_i32 = arith.constant 16 : i32
    %32 = vector.broadcast %c16_i32 : i32 to vector<1x128xi32>
    %33 = arith.cmpi slt, %31, %32 : vector<1x128xi32>
    %cst_26 = arith.constant 0.000000e+00 : f32
    %34 = vector.shape_cast %33 : vector<1x128xi1> to vector<1x128xi1>
    %35 = vector.broadcast %34 : vector<1x128xi1> to vector<8x128xi1>
    %36 = vector.broadcast %cst_26 : f32 to vector<8x128xf32>
    %37 = arith.select %35, %23, %36 : vector<8x128xi1>, vector<8x128xf32>
    %c0_27 = arith.constant 0 : index
    %c0_28 = arith.constant 0 : index
    %38 = vector.load %arg12[%c0_27, %c0_28] : memref<8x1xf32, #tpu.memory_space<vmem>>, vector<8x1xf32>
    %cst_29 = arith.constant dense<0.000000e+00> : vector<8xf32>
    %39 = vector.multi_reduction <add>, %37, %cst_29 [1] : vector<8x128xf32> to vector<8xf32>
    %40 = vector.shape_cast %39 : vector<8xf32> to vector<8x1xf32>
    %41 = arith.addf %38, %40 : vector<8x1xf32>
    %c0_30 = arith.constant 0 : index
    %c0_31 = arith.constant 0 : index
    %42 = vector.load %arg12[%c0_30, %c0_31] : memref<8x1xf32, #tpu.memory_space<vmem>>, vector<8x1xf32>
    tpu.vector_store %arg12[%c0_30, %c0_31], %41 {strides = array<i32>} : memref<8x1xf32, #tpu.memory_space<vmem>>, vector<8x1xf32>,
    %c0_32 = arith.constant 0 : index
    %c0_33 = arith.constant 0 : index
    %43 = vector.load %arg13[%c0_32, %c0_33] : memref<8x1xf32, #tpu.memory_space<vmem>>, vector<8x1xf32>
    %44 = arith.mulf %37, %37 : vector<8x128xf32>
    %cst_34 = arith.constant dense<0.000000e+00> : vector<8xf32>
    %45 = vector.multi_reduction <add>, %44, %cst_34 [1] : vector<8x128xf32> to vector<8xf32>
    %46 = vector.shape_cast %45 : vector<8xf32> to vector<8x1xf32>
    %47 = arith.addf %43, %46 : vector<8x1xf32>
    %c0_35 = arith.constant 0 : index
    %c0_36 = arith.constant 0 : index
    %48 = vector.load %arg13[%c0_35, %c0_36] : memref<8x1xf32, #tpu.memory_space<vmem>>, vector<8x1xf32>
    tpu.vector_store %arg13[%c0_35, %c0_36], %47 {strides = array<i32>} : memref<8x1xf32, #tpu.memory_space<vmem>>, vector<8x1xf32>,
    %c0_37 = arith.constant 0 : index
    %c0_38 = arith.constant 0 : index
    %49 = arith.index_cast %28 : i32 to index
    %50 = vector.load %arg11[%c0_37, %c0_38, %49] : memref<1x8x128xf32, #tpu.memory_space<vmem>>, vector<1x8x128xf32>
    %51 = vector.shape_cast %50 : vector<1x8x128xf32> to vector<8x128xf32>
    %52 = vector.shape_cast %23 : vector<8x128xf32> to vector<1x8x128xf32>
    tpu.vector_store %arg11[%c0_37, %c0_38, %49], %52 {strides = array<i32>} : memref<1x8x128xf32, #tpu.memory_space<vmem>>, vector<1x8x128xf32>,
    %c0_i32_39 = arith.constant 0 : i32
    %53 = arith.cmpi eq, %arg1, %c0_i32_39 : i32
    %54 = arith.extui %53 : i1 to i32
    %c0_i32_40 = arith.constant 0 : i32
    %55 = arith.cmpi ne, %54, %c0_i32_40 : i32
    scf.if %55 {
      %c0_41 = arith.constant 0 : index
      %c0_42 = arith.constant 0 : index
      %56 = vector.load %arg12[%c0_41, %c0_42] : memref<8x1xf32, #tpu.memory_space<vmem>>, vector<8x1xf32>
      %cst_43 = arith.constant 6.250000e-02 : f32
      %57 = vector.broadcast %cst_43 : f32 to vector<8x1xf32>
      %58 = arith.mulf %56, %57 : vector<8x1xf32>
      %c0_44 = arith.constant 0 : index
      %c0_45 = arith.constant 0 : index
      %59 = vector.load %arg13[%c0_44, %c0_45] : memref<8x1xf32, #tpu.memory_space<vmem>>, vector<8x1xf32>
      %cst_46 = arith.constant 6.250000e-02 : f32
      %60 = vector.broadcast %cst_46 : f32 to vector<8x1xf32>
      %61 = arith.mulf %59, %60 : vector<8x1xf32>
      %62 = arith.mulf %58, %58 : vector<8x1xf32>
      %63 = arith.subf %61, %62 : vector<8x1xf32>
      %c0_47 = arith.constant 0 : index
      %c0_48 = arith.constant 0 : index
      %c0_49 = arith.constant 0 : index
      %64 = vector.load %arg11[%c0_47, %c0_48, %c0_49] : memref<1x8x128xf32, #tpu.memory_space<vmem>>, vector<1x8x128xf32>
      %65 = vector.shape_cast %64 : vector<1x8x128xf32> to vector<8x128xf32>
      %66 = vector.broadcast %58 : vector<8x1xf32> to vector<8x128xf32>
      %67 = arith.subf %65, %66 : vector<8x128xf32>
      %cst_50 = arith.constant 9.99999974E-6 : f32
      %68 = vector.broadcast %cst_50 : f32 to vector<8x1xf32>
      %69 = arith.addf %63, %68 : vector<8x1xf32>
      %70 = math.rsqrt %69 : vector<8x1xf32>
      %71 = vector.broadcast %70 : vector<8x1xf32> to vector<8x128xf32>
      %72 = arith.mulf %67, %71 : vector<8x128xf32>
      %c0_51 = arith.constant 0 : index
      %c0_52 = arith.constant 0 : index
      %c0_53 = arith.constant 0 : index
      %73 = vector.load %arg11[%c0_51, %c0_52, %c0_53] : memref<1x8x128xf32, #tpu.memory_space<vmem>>, vector<1x8x128xf32>
      %74 = vector.shape_cast %73 : vector<1x8x128xf32> to vector<8x128xf32>
      %75 = vector.shape_cast %72 : vector<8x128xf32> to vector<1x8x128xf32>
      tpu.vector_store %arg11[%c0_51, %c0_52, %c0_53], %75 {strides = array<i32>} : memref<1x8x128xf32, #tpu.memory_space<vmem>>, vector<1x8x128xf32>,
    } else {
    }
    return
  }
  func.func @transform_0(%arg0: i32, %arg1: i32) -> (i32, i32, i32) {
    %c0_i32 = arith.constant 0 : i32
    %c0_i32_0 = arith.constant 0 : i32
    return %arg0, %c0_i32, %arg1 : i32, i32, i32
  }
  func.func @transform_1(%arg0: i32, %arg1: i32) -> (i32, i32, i32) {
    %c0_i32 = arith.constant 0 : i32
    %c0_i32_0 = arith.constant 0 : i32
    return %arg0, %c0_i32, %arg1 : i32, i32, i32
  }
  func.func @transform_2(%arg0: i32, %arg1: i32) -> (i32, i32, i32) {
    %c0_i32 = arith.constant 0 : i32
    %c0_i32_0 = arith.constant 0 : i32
    return %arg0, %c0_i32, %arg1 : i32, i32, i32
  }
  func.func @transform_3(%arg0: i32, %arg1: i32) -> (i32, i32, i32) {
    %c0_i32 = arith.constant 0 : i32
    %c0_i32_0 = arith.constant 0 : i32
    return %arg0, %c0_i32, %arg1 : i32, i32, i32
  }
  func.func @transform_4(%arg0: i32, %arg1: i32) -> (i32, i32) {
    %c0_i32 = arith.constant 0 : i32
    %c0_i32_0 = arith.constant 0 : i32
    %c0_i32_1 = arith.constant 0 : i32
    return %c0_i32, %c0_i32_0 : i32, i32
  }
  func.func @transform_5(%arg0: i32, %arg1: i32) -> (i32, i32) {
    %c0_i32 = arith.constant 0 : i32
    %c0_i32_0 = arith.constant 0 : i32
    %c0_i32_1 = arith.constant 0 : i32
    return %c0_i32, %c0_i32_0 : i32, i32
  }
  func.func @transform_6(%arg0: i32, %arg1: i32) -> (i32, i32) {
    %c0_i32 = arith.constant 0 : i32
    %c0_i32_0 = arith.constant 0 : i32
    %c0_i32_1 = arith.constant 0 : i32
    return %c0_i32, %c0_i32_0 : i32, i32
  }
  func.func @transform_7(%arg0: i32, %arg1: i32) -> (i32, i32) {
    %c0_i32 = arith.constant 0 : i32
    %c0_i32_0 = arith.constant 0 : i32
    %c0_i32_1 = arith.constant 0 : i32
    return %c0_i32, %c0_i32_0 : i32, i32
  }
  func.func @transform_8(%arg0: i32, %arg1: i32) -> (i32, i32) {
    %c0_i32 = arith.constant 0 : i32
    %c0_i32_0 = arith.constant 0 : i32
    %c0_i32_1 = arith.constant 0 : i32
    return %c0_i32, %c0_i32_0 : i32, i32
  }
  func.func @transform_9(%arg0: i32, %arg1: i32) -> (i32, i32, i32) {
    %c0_i32 = arith.constant 0 : i32
    %c0_i32_0 = arith.constant 0 : i32
    %c0_i32_1 = arith.constant 0 : i32
    return %arg0, %c0_i32, %c0_i32_0 : i32, i32, i32
  }
}

</mosaic_0001>

<bundles_post_ra>
// kernel: up_conv_forward.2
= control target key start
LH: loop header
LB: loop body
LE: loop exit
PB: predicated region body
PF: predicated region fallthrough
CT: control target
= control target key end

     0   :  { %s1412_s0 = inlined_call_operand.hbm [shape: f32[2,8,128], index: 0, kind: input, shape index: {}]   ;;  %s1413_s1 = inlined_call_operand.hbm [shape: f32[2,32,128], index: 1, kind: input, shape index: {}]   ;;  %s1414_s2 = inlined_call_operand.hbm [shape: f32[8,8], index: 2, kind: input, shape index: {}]   ;;  %s1415_s3 = inlined_call_operand.hbm [shape: f32[8,32], index: 3, kind: input, shape index: {}]   ;;  %s1416_s4 = inlined_call_operand.hbm [shape: f32[8,1], index: 4, kind: input, shape index: {}]   ;;  %s1417_s5 = inlined_call_operand.hbm [shape: f32[2,8,128], index: 5, kind: output, shape index: {}]  }
   0x1   :  { %1421 = sst [smem:[#allocation17_spill]] %s1412_s0 }
   0x2   :  { %1422 = sst [smem:[#allocation18_spill]] %s1414_s2 }
   0x3   :  { %1423 = sst [smem:[#allocation19_spill]] %s1415_s3 }
   0x4   :  { %10 = vsyncpa [#allocation3], 0 }
   0x5   :  { %12 = vsyncpa [#allocation3 + $0x1], 0 }
   0x6   :  { %13 = vsyncpa [#allocation6], 0 }
   0x7   :  { %15 = vsyncpa [#allocation6 + $0x1], 0 }
   0x8   :  { %16 = vsyncpa [#allocation9], 0 }
   0x9   :  { %17 = vsyncpa [#allocation4], 0 }
   0xa   :  { %19 = vsyncpa [#allocation4 + $0x1], 0  ;;  %s1090_s18 = smov 0   ;;  %s1092_s19 = smov 0  }
   0xb   :  { %s1094_s20 = smov 0   ;;  %s1096_s21 = smov 0  }
   0xc   :  { %s1098_s22 = smov 0   ;;  %s1100_s23 = smov 0  }
   0xd LB: > { %s1121_s24 = sadd.s32 4294967295, %s1046_s23   ;;  %s649_s25 = sadd.s32 4294967294, %s1046_s23   ;;  %s1046_s23 = sphi %s1100_s23, %s25_s23   ;;  %s1042_s22 = sphi %s1098_s22, %s1448_s22   ;;  %s1038_s21 = sphi %s1096_s21, %s1447_s21   ;;  %s1034_s20 = sphi %s1094_s20, %s1446_s20   ;;  %s1030_s19 = sphi %s1092_s19, %s1445_s19   ;;  %s1026_s18 = sphi %s1090_s18, %s1444_s18  }
   0xe   : > { %p59_p0 = scmp.ne.s32.totalorder %s1030_s19, %s1026_s18  ;;  %p1418_p1 = scmp.eq.s32.totalorder %s1121_s24, 0 }
   0xf   : > { %p182_p3 = scmp.eq.s32.totalorder %s649_s25, 1  ;;  %p650_p5 = scmp.ge.s32.totalorder %s1046_s23, 1 }
  0x10   : > { %p1130_p4 = por %p1418_p1, %p59_p0  ;;  %p189_p7 = scmp.lt.s32.totalorder %s1046_s23, 3 }
  0x11   : > { %p1135_p6 = por %p182_p3, %p59_p0  ;;  %s1048_s29 = smov [#allocation7]  }
  0x12   : > { %s1424_s26 = scalar_select %p1130_p4, 1, 0 }
  0x13   : > { %s1425_s27 = scalar_select %p1135_p6, 1, 0 }
  0x14   : > { %p1140_p8 = pnand %p650_p5, %p189_p7  ;;  %s202_s30 = sshll.u32 %s1048_s29, 4  ;;  %s203_s30 = int_to_ptr.vmem [resolvable:$true] %s202_s30 }
  0x15   : > { %s1049_s6 = smov [#allocation8]   ;;  %s1050_s9 = smov [#allocation10]  }
  0x16   : > { %s1426_s28 = scalar_select %p1140_p8, 1, 0 }
  0x17   : > { %p721_p10 = pneg %p1140_p8  ;;  %s213_s7 = sshll.u32 %s1049_s6, 4  ;;  %s1153_s7 = int_to_ptr.vmem [resolvable:$true] %s213_s7 }
  0x18   : > { %s224_s10 = sshll.u32 %s1050_s9, 4  ;;  %s1428_s2 = sld [smem:[#allocation18_spill]]  ;;  %s1155_s10 = int_to_ptr.vmem [resolvable:$true] %s224_s10 }
  0x19   : > { %p1149_p11 = pnand %p721_p10, %p1418_p1 }
  0x1b   : > { %p1165_p13 = pneg %p1149_p11 }
  0x1e   : > { %s808_s13 = scalar_lea.hbm %s1428_s2, 128 }
  0x1f   : > { %p809_p12 = scmp.ne.s32.totalorder %s1428_s2, %s808_s13  ;;  %p815_p5 = scmp.lt.u32.totalorder %s808_s13, %s1428_s2 }
  0x21   : > { %p811_p0 = pnand %p1165_p13, %p809_p12 }
  0x23   : > { %p812_p3 = pneg %p811_p0 }
  0x25   : > { %p817_p7 = pnand %p815_p5, %p812_p3 }
  0x27   : > { %820 = shalt.err (!%p817_p7)
}
  0x28   : > { %s821_s29 = scalar_lea.vmem %s203_s30, 128  ;;  %p829_p2 = scmp.lt.s32.totalorder %s203_s30, %s203_s30 }
  0x29   : > { %p822_p10 = scmp.ne.s32.totalorder %s203_s30, %s821_s29  ;;  %p830_p6 = scmp.lt.s32.totalorder %s821_s29, %s821_s29 }
  0x2b   : > { %p824_p9 = pnand %p822_p10, %p1165_p13  ;;  %p831_p4 = por %p830_p6, %p829_p2 }
  0x2d   : > { %p825_p1 = pneg %p824_p9 }
  0x2f   : > { %p832_p8 = pnand %p831_p4, %p825_p1 }
  0x31   : > { %835 = shalt.err (!%p832_p8)
}
  0x32   : > { %724 = dma.hbm_to_vmem [thread:$0]  (!%p1149_p11), %s1428_s2, 128, %s203_s30, [#allocation6]  }
  0x33   : > { %s1430_s3 = sld [smem:[#allocation19_spill]] }
  0x39   : > { %s836_s13 = scalar_lea.hbm %s1430_s3, 128 }
  0x3a   : > { %p837_p9 = scmp.ne.s32.totalorder %s1430_s3, %s836_s13  ;;  %p843_p1 = scmp.lt.u32.totalorder %s836_s13, %s1430_s3 }
  0x3c   : > { %p839_p12 = pnand %p837_p9, %p1165_p13 }
  0x3e   : > { %p840_p2 = pneg %p839_p12 }
  0x40   : > { %p845_p4 = pnand %p843_p1, %p840_p2 }
  0x42   : > { %848 = shalt.err (!%p845_p4)
}
  0x43   : > { %s849_s30 = scalar_lea.vmem %s1153_s7, 128  ;;  %p857_p3 = scmp.lt.s32.totalorder %s1153_s7, %s1153_s7 }
  0x44   : > { %p850_p6 = scmp.ne.s32.totalorder %s1153_s7, %s849_s30  ;;  %p858_p5 = scmp.lt.s32.totalorder %s849_s30, %s849_s30 }
  0x46   : > { %p852_p8 = pnand %p850_p6, %p1165_p13  ;;  %p859_p7 = por %p858_p5, %p857_p3 }
  0x48   : > { %p853_p0 = pneg %p852_p8 }
  0x4a   : > { %p860_p10 = pnand %p859_p7, %p853_p0 }
  0x4c   : > { %863 = shalt.err (!%p860_p10)
}
  0x4d   : > { %727 = dma.hbm_to_vmem [thread:$0]  (!%p1149_p11), %s1430_s3, 128, %s1153_s7, [#allocation9]  }
  0x4e   : > { %s864_s12 = scalar_lea.hbm %s1416_s4, 128 }
  0x4f   : > { %p865_p9 = scmp.ne.s32.totalorder %s1416_s4, %s864_s12  ;;  %p871_p1 = scmp.lt.u32.totalorder %s864_s12, %s1416_s4 }
  0x51   : > { %p867_p12 = pnand %p865_p9, %p1165_p13 }
  0x53   : > { %p868_p2 = pneg %p867_p12 }
  0x55   : > { %p873_p4 = pnand %p871_p1, %p868_p2 }
  0x57   : > { %876 = shalt.err (!%p873_p4)
}
  0x58   : > { %s877_s7 = scalar_lea.vmem %s1155_s10, 128  ;;  %p885_p3 = scmp.lt.s32.totalorder %s1155_s10, %s1155_s10 }
  0x59   : > { %p878_p6 = scmp.ne.s32.totalorder %s1155_s10, %s877_s7  ;;  %p886_p5 = scmp.lt.s32.totalorder %s877_s7, %s877_s7 }
  0x5b   : > { %p880_p8 = pnand %p878_p6, %p1165_p13  ;;  %p887_p7 = por %p886_p5, %p885_p3 }
  0x5d   : > { %p881_p0 = pneg %p880_p8 }
  0x5f   : > { %p888_p10 = pnand %p887_p7, %p881_p0 }
  0x61   : > { %891 = shalt.err (!%p888_p10)
}
  0x62   : > { %730 = dma.hbm_to_vmem [thread:$0]  (!%p1149_p11), %s1416_s4, 128, %s1155_s10, [#allocation9]  }
  0x63   : > { %s46_s16 = sadd.s32 1, %s1034_s20  ;;  %s37_s29 = sadd.s32 1, %s1042_s22 }
  0x64   : > { %p53_p13 = scmp.ne.s32.totalorder %s1034_s20, %s1030_s19  ;;  %p39_p9 = scmp.ge.s32.totalorder %s37_s29, 2 }
  0x65   : > { %p54_p12 = scmp.eq.s32.totalorder %s1046_s23, 0  ;;  %p1431_p2 = scmp.eq.s32.totalorder %s1121_s24, 1 }
  0x66   : > { %p745_p4 = scmp.lt.s32.totalorder %s1046_s23, 2  ;;  %s1450_s29 = smov (%p39_p9, %s37_s29), 0 }
  0x67   : > { %p1234_p1 = por %p1431_p2, %p53_p13  ;;  %p55_p6 = por %p54_p12, %p53_p13 }
  0x68   : > { %s1242_s6 = sand.u32 1, %s1034_s20   ;;  %s41_s10 = ssub.s32 %s1042_s22, %s1450_s29 }
  0x69   : > { %p44_p11 = scmp.eq.s32.totalorder %s41_s10, 0  ;;  %s655_s9 = sshll.u32 %s1242_s6, 3 }
  0x6a   : > { %s656_s11 = sshll.u32 %s1042_s22, 7  ;;  %s1433_s0 = sld [smem:[#allocation17_spill]] }
  0x6b   : > { %s1249_s12 = scalar_select %p44_p11, %s1034_s20, %s46_s16  }
  0x6c   : > { %s239_s17 = scalar_lea.vmem [#allocation2], %s655_s9  ;;  %p1260_p8 = pnand %p745_p4, %p55_p6 }
  0x6d   : > { %s247_s7 = sshll.u32 %s239_s17, 4  ;;  %s657_s30 = sshll.u32 %s1242_s6, 5  ;;  %s1256_s7 = int_to_ptr.vmem [resolvable:$true] %s247_s7 }
  0x6e   : > { %s236_s10 = scalar_lea.sflag [#allocation3], %s1242_s6  ;;  %p894_p3 = pneg %p1260_p8 }
  0x70   : > { %s1254_s15 = scalar_lea.hbm %s1433_s0, %s656_s11  ;;  %s897_s14 = scalar_lea.hbm %s1433_s0, 256 }
  0x71   : > { %s892_s11 = scalar_lea.hbm %s1254_s15, 128  ;;  %p898_p10 = scmp.lt.u32.totalorder %s1254_s15, %s1433_s0 }
  0x72   : > { %p893_p0 = scmp.ne.s32.totalorder %s1254_s15, %s892_s11  ;;  %p899_p13 = scmp.lt.u32.totalorder %s897_s14, %s892_s11 }
  0x73   : > { %p901_p12 = scmp.lt.u32.totalorder %s892_s11, %s1254_s15 }
  0x74   : > { %p895_p5 = pnand %p894_p3, %p893_p0  ;;  %p900_p9 = por %p899_p13, %p898_p10 }
  0x76   : > { %p896_p7 = pneg %p895_p5  ;;  %p902_p2 = por %p901_p12, %p900_p9 }
  0x78   : > { %p903_p4 = pnand %p902_p2, %p896_p7 }
  0x7a   : > { %906 = shalt.err (!%p903_p4)
}
  0x7b   : > { %s907_s16 = scalar_lea.vmem %s1256_s7, 128  ;;  %s1051_s9 = smov [#allocation2]  }
  0x7c   : > { %p908_p6 = scmp.ne.s32.totalorder %s1256_s7, %s907_s16  ;;  %s912_s13 = sshll.u32 %s1051_s9, 4  ;;  %s913_s13 = int_to_ptr.vmem [resolvable:$false] %s912_s13 }
  0x7d   : > { %s914_s2 = scalar_lea.vmem %s913_s13, 256  ;;  %p915_p5 = scmp.lt.s32.totalorder %s1256_s7, %s913_s13 }
  0x7e   : > { %p910_p11 = pnand %p908_p6, %p894_p3  ;;  %p916_p10 = scmp.lt.s32.totalorder %s914_s2, %s907_s16 }
  0x80   : > { %p911_p0 = pneg %p910_p11  ;;  %p917_p13 = por %p916_p10, %p915_p5 }
  0x82   : > { %p918_p9 = pnand %p917_p13, %p911_p0 }
  0x84   : > { %921 = shalt.err (!%p918_p9)
}
  0x85   : > { %734 = dma.hbm_to_vmem [thread:$0]  (!%p1260_p8), %s1254_s15, 128, %s1256_s7, %s236_s10  }
  0x86   : > { %s258_s11 = scalar_lea.vmem [#allocation5], %s657_s30  ;;  %s254_s17 = sand.u32 1, %s1046_s23  }
  0x87   : > { %s266_s14 = sshll.u32 %s258_s11, 4  ;;  %s1435_s9 = sshll.u32 %s1042_s22, 9  ;;  %s1295_s14 = int_to_ptr.vmem [resolvable:$true] %s266_s14 }
  0x88   : > { %s1302_s2 = scalar_lea.hbm %s1413_s1, %s1435_s9  ;;  %s1304_s0 = scalar_lea.sflag [#allocation6], %s254_s17 }
  0x89   : > { %s922_s3 = scalar_lea.hbm %s1302_s2, 512  ;;  %s927_s7 = scalar_lea.hbm %s1413_s1, 1024 }
  0x8a   : > { %p923_p7 = scmp.ne.s32.totalorder %s1302_s2, %s922_s3  ;;  %p928_p4 = scmp.lt.u32.totalorder %s1302_s2, %s1413_s1 }
  0x8b   : > { %p929_p6 = scmp.lt.u32.totalorder %s927_s7, %s922_s3  ;;  %p931_p0 = scmp.lt.u32.totalorder %s922_s3, %s1302_s2 }
  0x8c   : > { %p925_p12 = pnand %p923_p7, %p894_p3 }
  0x8d   : > { %p930_p11 = por %p929_p6, %p928_p4 }
  0x8e   : > { %p926_p2 = pneg %p925_p12 }
  0x8f   : > { %p932_p5 = por %p931_p0, %p930_p11 }
  0x91   : > { %p933_p10 = pnand %p932_p5, %p926_p2 }
  0x93   : > { %936 = shalt.err (!%p933_p10)
}
  0x94   : > { %s937_s11 = scalar_lea.vmem %s1295_s14, 512  ;;  %s1052_s17 = smov [#allocation5]  }
  0x95   : > { %p938_p13 = scmp.ne.s32.totalorder %s1295_s14, %s937_s11  ;;  %s942_s9 = sshll.u32 %s1052_s17, 4  ;;  %s943_s9 = int_to_ptr.vmem [resolvable:$false] %s942_s9 }
  0x96   : > { %s944_s16 = scalar_lea.vmem %s943_s9, 1024  ;;  %p945_p12 = scmp.lt.s32.totalorder %s1295_s14, %s943_s9 }
  0x97   : > { %p940_p9 = pnand %p938_p13, %p894_p3  ;;  %p946_p4 = scmp.lt.s32.totalorder %s944_s16, %s937_s11 }
  0x99   : > { %p941_p7 = pneg %p940_p9  ;;  %p947_p6 = por %p946_p4, %p945_p12 }
  0x9b   : > { %p948_p11 = pnand %p947_p6, %p941_p7 }
  0x9d   : > { %951 = shalt.err (!%p948_p11)
}
  0x9e   : > { %s1053_s3 = smov 128   ;;  %s1054_s13 = smov 8  }
  0x9f   : > { %737 = dma.hbm_to_vmem [thread:$0]  (!%p1260_p8), %s1302_s2, 512, %s1295_s14, %s1304_s0, %s1053_s3, %s1053_s3, %s1054_s13  }
  0xa0   : > { %p1436_p3 = scmp.ne.s32.totalorder %s1426_s28, 0 }
  0xa1   : > { %s1333_s6 = sand.u32 (!%p1436_p3), 1, %s1030_s19   ;;  %p1437_p2 = scmp.ne.s32.totalorder (!%p1436_p3), %s1424_s26, 0 }
  0xa2   : > { %278 = sbr.rel (%p1436_p3) target bundleno = 421 (0x1a5), region = 40  ;;  %s661_s15 = sshll.u32 (!%p1436_p3), %s1333_s6, 3 }
  0xa3   : > { %s281_s7 = scalar_lea.sflag (!%p1436_p3), [#allocation3], %s1333_s6  ;;  %s284_s30 = scalar_lea.vmem (!%p1436_p3), [#allocation2], %s661_s15 }
  0xa9   : > { %1005 = dma.done.wait (%p1437_p2), %s281_s7, 128  }
  0xaa   : > { %1007 = vsyncadd (%p1437_p2), %s281_s7, 4294967168  ;;  %s289_s0 = sand.u32 1, %s1121_s24   ;;  %s662_s28 = sshll.u32 %s1333_s6, 5 }
  0xab   : > { %s290_s25 = scalar_lea.sflag [#allocation6], %s289_s0  ;;  %s293_s14 = scalar_lea.vmem [#allocation5], %s662_s28 }
  0xac   : > { %1009 = dma.done.wait (%p1437_p2), %s290_s25, 512  }
  0xad   : > { %1011 = vsyncadd (%p1437_p2), %s290_s25, 4294966784  ;;  %p1438_p8 = scmp.eq.s32.totalorder %s1121_s24, 0 }
  0xaf   : > { %1013 = dma.done.wait (%p1438_p8), [#allocation6], 128   ;;  %p1439_p0 = pmov %p1438_p8 }
  0xb1   : > { %1015 = vsyncadd (%p1439_p0), [#allocation6], 4294967168  ;;  %p1440_p5 = pmov %p1439_p0 }
  0xb2   : > { %p1441_p10 = pmov %p1439_p0 }
  0xb3   : > { %1017 = dma.done.wait (%p1440_p5), [#allocation9], 256  }
  0xb4   : > { %1019 = vsyncadd (%p1441_p10), [#allocation9], 4294967040  ;;  %v1055_v0 = vmov 0.0|0.0   ;;  %v1056_v1 = vmov 0.0   ;;  %vm1057_vm0 = vmmov 0   ;;  %v1058_v2 = vmov 0  }
  0xb5   : > { %697 = vmatprep.subr.bf16.mxu0 %v1055_v0  ;;  %692 = vmatprep.subr.mxu1 %v1056_v1  ;;  %v340_v3 = vld [vmem:[%s293_s14] sm:$0xff]  ;;  %v341_v4 = vld [vmem:[%s293_s14 + $0x8] sm:$0xff]  ;;  %v342_v5 = vld [vmem:[%s293_s14 + $0x10] sm:$0xff]  ;;  %vm418_vm1 = vcmask 64512   ;;  %vm344_vm2 = vcmask 261120   ;;  %s670_s24 = sshll.u32 %s1038_s21, 7 }
  0xb6   : > { %694 = vmatprep.mubr.msk.f32.mxu1 %vm1057_vm0, %v1056_v1  ;;  %689 = vmatprep.mubr.msk.f32.mxu0 %vm1057_vm0, %v1056_v1  ;;  %v698_v6 = vpack.c.bf16 %v341_v4, %v340_v3  ;;  %v343_v7 = vld [vmem:[%s293_s14 + $0x18] sm:$0xff]  ;;  %v337_v9 = vld [vmem:[#allocation7] sm:$0xff]  ;;  %v492_v10 = vld [vmem:[#allocation10] sm:$0xff]  ;;  %s336_s26 = scalar_lea.vmem [#allocation11], %s661_s15  ;;  %s1363_s17 = scalar_lea.hbm %s1417_s5, %s670_s24 }
  0xb7   : > { %807 = vset.pattern.permute.xlu0 %v1058_v2  ;;  %v338_v8 = vld [vmem:[%s284_s30] sm:$0xff]  ;;  %v701_v11 = vpack.c.bf16 %v343_v7, %v342_v5  ;;  %v339_v12 = vld [vmem:[#allocation8] sm:$0xff]  ;;  %s515_s2 = sshll.u32 %s336_s26, 4  ;;  %s501_s9 = scalar_lea.sflag [#allocation4], %s1333_s6  ;;  %s1365_s2 = int_to_ptr.vmem [resolvable:$true] %s515_s2 }
  0xb8   : > { %693 = vmatpush3.msra.mxu1 %v338_v8  ;;  %699 = vmatpush3.bf16.msra.mxu0 %v698_v6  ;;  %s952_s16 = scalar_lea.vmem %s1365_s2, 128  ;;  %s1059_s21 = smov [#allocation11]  }
  0xb9   : > { %695 = vmatmul.mubr.msk.f32.vlgmr.msra.gmra.mrb[0].mxu1 %vm418_vm1, %v337_v9  ;;  %700 = vmatprep.subr.bf16.mxu0 %v1055_v0  ;;  %p953_p13 = scmp.ne.s32.totalorder %s1365_s2, %s952_s16  ;;  %s956_s3 = sshll.u32 %s1059_s21, 4  ;;  %s957_s3 = int_to_ptr.vmem [resolvable:$false] %s956_s3 }
  0xba   : > { %495 = vperm.xlu0 %807, %v492_v10   ;;  %s958_s13 = scalar_lea.vmem %s957_s3, 256  ;;  %p959_p12 = scmp.lt.s32.totalorder %s1365_s2, %s957_s3 }
  0xbb   : > { %p954_p9 = pnand %p953_p13, %p1234_p1  ;;  %p960_p4 = scmp.lt.s32.totalorder %s958_s13, %s952_s16 }
  0xbc   : > { %702 = vmatpush3.bf16.msra.mxu0 %v701_v11 }
  0xbd   : > { %p955_p7 = pneg %p954_p9  ;;  %p961_p6 = por %p960_p4, %p959_p12 }
  0xbf   : > { %690 = vmatmul.mubr.msk.f32.vlgmr.msra.gmra.mrb[0].mxu0 %vm344_vm2, %v339_v12  ;;  %p962_p11 = pnand %p961_p6, %p955_p7 }
 0x139   : > { %v496_v16 = vpop.permute.xlu0 %495 }
 0x18c   : > { %v488_v13 = vpop.f32.mrb[0].mxu1 }
 0x18d   : > { %v696_v14 = vpop.f32.mrb[1].mxu1 }
 0x192   : > { %v414_v15 = vpop.f32.mrb[0].mxu0 }
 0x193   : > { %v489_v17 = vadd.f32 %v488_v13, %v414_v15  ;;  %v691_v18 = vpop.f32.mrb[1].mxu0 }
 0x195   : > { %v498_v19 = vadd.f32 %v496_v16, %v489_v17 }
 0x197   : > { %499 = vst [vmem:[%s336_s26] sm:$0xff] %v498_v19 }
 0x198   : > { %965 = shalt.err (!%p962_p11)
}
 0x199   : > { %s966_s6 = scalar_lea.hbm %s1363_s17, 128  ;;  %s970_s30 = scalar_lea.hbm %s1417_s5, 256 }
 0x19a   : > { %p967_p3 = scmp.ne.s32.totalorder %s1363_s17, %s966_s6  ;;  %p971_p0 = scmp.lt.u32.totalorder %s1363_s17, %s1417_s5 }
 0x19b   : > { %p972_p5 = scmp.lt.u32.totalorder %s970_s30, %s966_s6  ;;  %p974_p13 = scmp.lt.u32.totalorder %s966_s6, %s1363_s17 }
 0x19c   : > { %p968_p2 = pnand %p967_p3, %p1234_p1 }
 0x19d   : > { %p973_p10 = por %p972_p5, %p971_p0 }
 0x19e   : > { %p969_p8 = pneg %p968_p2 }
 0x19f   : > { %p975_p9 = por %p974_p13, %p973_p10 }
 0x1a1   : > { %p976_p7 = pnand %p975_p9, %p969_p8 }
 0x1a3   : > { %979 = shalt.err (!%p976_p7)
}
 0x1a4   : > { %719 = dma.vmem_to_hbm [thread:$0]  (%p1234_p1), %s1365_s2, 128, %s1363_s17, %s501_s9  }
 0x1a5 PF: > { %s527_s25 = sand.u32 1, %s1026_s18   ;;  %p1442_p12 = scmp.ne.s32.totalorder %s1425_s27, 0 }
 0x1a6   : > { %p1443_p4 = scmp.ge.s32.totalorder %s1046_s23, 2  ;;  %s528_s14 = scalar_lea.sflag [#allocation4], %s527_s25 }
 0x1a8   : > { %p739_p6 = pnand %p1443_p4, %p1442_p12 }
 0x1aa   : > { %1021 = dma.done.wait (!%p739_p6), %s528_s14, 128  }
 0x1ab   : > { %1023 = vsyncadd (!%p739_p6), %s528_s14, 4294967168  ;;  %s25_s23 = sadd.s32 1, %s1046_s23   ;;  %s1444_s18 = smov %s1030_s19 }
 0x1ac   : > { %p22_p11 = scmp.ge.s32.totalorder %s25_s23, 4   ;;  %s1445_s19 = smov %s1034_s20 }
 0x1ad   : > { %s1446_s20 = smov %s1249_s12  ;;  %s1447_s21 = smov %s1042_s22 }
 0x1ae   : > { %s1448_s22 = smov %s1450_s29  ;;  %24 = sbr.rel (!%p22_p11) target bundleno = 13 (0xd), region = 110 }
 0x1b5   :  { %533 = vsyncpa [#allocation3], 1 }
 0x1b6   :  { %535 = vsyncpa [#allocation3 + $0x1], 1 }
 0x1b7   :  { %536 = vsyncpa [#allocation6], 1 }
 0x1b8   :  { %538 = vsyncpa [#allocation6 + $0x1], 1 }
 0x1b9   :  { %539 = vsyncpa [#allocation9], 1 }
 0x1ba   :  { %540 = vsyncpa [#allocation4], 1 }
 0x1bb   :  { %542 = vsyncpa [#allocation4 + $0x1], 1 }

// kernel: up_conv_forward.3
= control target key start
LH: loop header
LB: loop body
LE: loop exit
PB: predicated region body
PF: predicated region fallthrough
CT: control target
= control target key end

     0   :  { %s2265_s0 = inlined_call_operand.hbm [shape: f32[2,8,128], index: 0, kind: input, shape index: {}]   ;;  %s2266_s1 = inlined_call_operand.hbm [shape: f32[2,8,128], index: 1, kind: input, shape index: {}]   ;;  %s2267_s2 = inlined_call_operand.hbm [shape: f32[2,32,128], index: 2, kind: input, shape index: {}]   ;;  %s2268_s3 = inlined_call_operand.hbm [shape: f32[2,32,128], index: 3, kind: input, shape index: {}]   ;;  %s2269_s4 = inlined_call_operand.hbm [shape: f32[8,8], index: 4, kind: input, shape index: {}]   ;;  %s2270_s5 = inlined_call_operand.hbm [shape: f32[8,8], index: 5, kind: input, shape index: {}]   ;;  %s2271_s6 = inlined_call_operand.hbm [shape: f32[8,32], index: 6, kind: input, shape index: {}]   ;;  %s2272_s7 = inlined_call_operand.hbm [shape: f32[8,32], index: 7, kind: input, shape index: {}]   ;;  %s2273_s8 = inlined_call_operand.hbm [shape: f32[8,1], index: 8, kind: input, shape index: {}]   ;;  %s2274_s9 = inlined_call_operand.hbm [shape: f32[2,8,128], index: 9, kind: output, shape index: {}]  }
   0x1   :  { %2301 = sst [smem:[#allocation36_spill]] %s2266_s1 }
   0x2   :  { %2302 = sst [smem:[#allocation37_spill]] %s2269_s4 }
   0x3   :  { %2303 = sst [smem:[#allocation38_spill]] %s2270_s5 }
   0x4   :  { %2304 = sst [smem:[#allocation39_spill]] %s2272_s7 }
   0x5   :  { %2305 = sst [smem:[#allocation40_spill]] %s2274_s9 }
   0x6   :  { %14 = vsyncpa [#allocation5], 0 }
   0x7   :  { %16 = vsyncpa [#allocation5 + $0x1], 0 }
   0x8   :  { %17 = vsyncpa [#allocation8], 0 }
   0x9   :  { %19 = vsyncpa [#allocation8 + $0x1], 0 }
   0xa   :  { %20 = vsyncpa [#allocation11], 0 }
   0xb   :  { %22 = vsyncpa [#allocation11 + $0x1], 0 }
   0xc   :  { %23 = vsyncpa [#allocation14], 0 }
   0xd   :  { %24 = vsyncpa [#allocation17], 0 }
   0xe   :  { %25 = vsyncpa [#allocation6], 0 }
   0xf   :  { %27 = vsyncpa [#allocation6 + $0x1], 0  ;;  %s1800_s30 = smov 0   ;;  %s1802_s10 = smov 0  }
  0x10   :  { %s1804_s11 = smov 0   ;;  %s1806_s12 = smov 0  }
  0x11   :  { %s1808_s13 = smov 0   ;;  %s1810_s14 = smov 0  }
  0x12 LB: > { %2306 = sst [smem:[#allocation27_spill]] %s1712_s30  ;;  %s1831_s15 = sadd.s32 4294967295, %s1732_s14   ;;  %s1732_s14 = sphi %s1810_s14, %s33_s14   ;;  %s1728_s13 = sphi %s1808_s13, %s2363_s13   ;;  %s1724_s12 = sphi %s1806_s12, %s2362_s12   ;;  %s1720_s11 = sphi %s1804_s11, %s2358_s11   ;;  %s1716_s10 = sphi %s1802_s10, %s2361_s10   ;;  %s1712_s30 = sphi %s1800_s30, %s2360_s30  }
  0x13   : > { %2307 = sst [smem:[#allocation28_spill]] %s1720_s11  ;;  %p1136_p0 = scmp.ge.s32.totalorder %s1732_s14, 1 }
  0x14   : > { %2308 = sst [smem:[#allocation29_spill]] %s1724_s12  ;;  %p2275_p1 = scmp.eq.s32.totalorder %s1831_s15, 0 }
  0x15   : > { %2309 = sst [smem:[#allocation30_spill]] %s1831_s15  ;;  %p293_p2 = scmp.lt.s32.totalorder %s1732_s14, 3 }
  0x16   : > { %s1734_s17 = smov [#allocation12]   ;;  %s1735_s19 = smov [#allocation13]  }
  0x17   : > { %p1836_p3 = pnand %p1136_p0, %p293_p2  ;;  %s306_s18 = sshll.u32 %s1734_s17, 4  ;;  %s307_s18 = int_to_ptr.vmem [resolvable:$true] %s306_s18 }
  0x18   : > { %s317_s20 = sshll.u32 %s1735_s19, 4  ;;  %s1736_s22 = smov [#allocation16]   ;;  %s1849_s20 = int_to_ptr.vmem [resolvable:$true] %s317_s20 }
  0x19   : > { %s2310_s16 = scalar_select %p1836_p3, 1, 0 }
  0x1a   : > { %p1262_p5 = pneg %p1836_p3  ;;  %s339_s23 = sshll.u32 %s1736_s22, 4  ;;  %s1851_s23 = int_to_ptr.vmem [resolvable:$true] %s339_s23 }
  0x1b   : > { %s2312_s4 = sld [smem:[#allocation37_spill]] }
  0x1c   : > { %p1845_p6 = pnand %p1262_p5, %p2275_p1 }
  0x1e   : > { %s2311_s21 = scalar_select %p1845_p6, 1, 0 }
  0x1f   : > { %p1861_p8 = pneg %p1845_p6 }
  0x21   : > { %s1370_s26 = scalar_lea.hbm %s2312_s4, 128 }
  0x22   : > { %p1371_p7 = scmp.ne.s32.totalorder %s2312_s4, %s1370_s26  ;;  %p1377_p11 = scmp.lt.u32.totalorder %s1370_s26, %s2312_s4 }
  0x23   : > { %s2313_s29 = scalar_select %p1861_p8, 1, 0 }
  0x24   : > { %p1373_p9 = pnand %p1861_p8, %p1371_p7 }
  0x26   : > { %p1374_p10 = pneg %p1373_p9 }
  0x28   : > { %p1379_p12 = pnand %p1377_p11, %p1374_p10 }
  0x2a   : > { %1382 = shalt.err (!%p1379_p12)
}
  0x2b   : > { %s1383_s22 = scalar_lea.vmem %s307_s18, 128  ;;  %p1391_p5 = scmp.lt.s32.totalorder %s307_s18, %s307_s18 }
  0x2c   : > { %p1384_p13 = scmp.ne.s32.totalorder %s307_s18, %s1383_s22  ;;  %p1392_p4 = scmp.lt.s32.totalorder %s1383_s22, %s1383_s22 }
  0x2e   : > { %p1386_p0 = pnand %p1384_p13, %p1861_p8  ;;  %p1393_p1 = por %p1392_p4, %p1391_p5 }
  0x30   : > { %p1387_p2 = pneg %p1386_p0 }
  0x32   : > { %p1394_p3 = pnand %p1393_p1, %p1387_p2 }
  0x34   : > { %1397 = shalt.err (!%p1394_p3)
}
  0x35   : > { %1265 = dma.hbm_to_vmem [thread:$0]  (!%p1845_p6), %s2312_s4, 128, %s307_s18, [#allocation11]  }
  0x36   : > { %s2314_s5 = sld [smem:[#allocation38_spill]] }
  0x3c   : > { %s1398_s28 = scalar_lea.hbm %s2314_s5, 128 }
  0x3d   : > { %p1399_p7 = scmp.ne.s32.totalorder %s2314_s5, %s1398_s28  ;;  %p1405_p1 = scmp.lt.u32.totalorder %s1398_s28, %s2314_s5 }
  0x3f   : > { %p1401_p9 = pnand %p1399_p7, %p1861_p8 }
  0x41   : > { %p1402_p4 = pneg %p1401_p9 }
  0x43   : > { %p1407_p3 = pnand %p1405_p1, %p1402_p4 }
  0x45   : > { %1410 = shalt.err (!%p1407_p3)
}
  0x46   : > { %s1411_s18 = scalar_lea.vmem %s1849_s20, 128  ;;  %p1419_p13 = scmp.lt.s32.totalorder %s1849_s20, %s1849_s20 }
  0x47   : > { %p1412_p10 = scmp.ne.s32.totalorder %s1849_s20, %s1411_s18  ;;  %p1420_p0 = scmp.lt.s32.totalorder %s1411_s18, %s1411_s18 }
  0x49   : > { %p1414_p11 = pnand %p1412_p10, %p1861_p8  ;;  %p1421_p2 = por %p1420_p0, %p1419_p13 }
  0x4b   : > { %p1415_p12 = pneg %p1414_p11 }
  0x4d   : > { %p1422_p5 = pnand %p1421_p2, %p1415_p12 }
  0x4f   : > { %1425 = shalt.err (!%p1422_p5)
}
  0x50   : > { %1268 = dma.hbm_to_vmem [thread:$0]  (!%p1845_p6), %s2314_s5, 128, %s1849_s20, [#allocation14]  }
  0x51   : > { %s2315_s7 = sld [smem:[#allocation39_spill]] }
  0x57   : > { %s1426_s27 = scalar_lea.hbm %s2315_s7, 128 }
  0x58   : > { %p1427_p7 = scmp.ne.s32.totalorder %s2315_s7, %s1426_s27  ;;  %p1433_p1 = scmp.lt.u32.totalorder %s1426_s27, %s2315_s7 }
  0x5a   : > { %p1429_p9 = pnand %p1427_p7, %p1861_p8 }
  0x5c   : > { %p1430_p4 = pneg %p1429_p9 }
  0x5e   : > { %p1435_p3 = pnand %p1433_p1, %p1430_p4 }
  0x60   : > { %1438 = shalt.err (!%p1435_p3)
}
  0x61   : > { %s1439_s20 = scalar_lea.vmem %s1851_s23, 128  ;;  %p1447_p13 = scmp.lt.s32.totalorder %s1851_s23, %s1851_s23 }
  0x62   : > { %p1440_p10 = scmp.ne.s32.totalorder %s1851_s23, %s1439_s20  ;;  %p1448_p0 = scmp.lt.s32.totalorder %s1439_s20, %s1439_s20 }
  0x64   : > { %p1442_p11 = pnand %p1440_p10, %p1861_p8  ;;  %p1449_p2 = por %p1448_p0, %p1447_p13 }
  0x66   : > { %p1443_p12 = pneg %p1442_p11 }
  0x68   : > { %p1450_p5 = pnand %p1449_p2, %p1443_p12 }
  0x6a   : > { %1453 = shalt.err (!%p1450_p5)
}
  0x6b   : > { %1274 = dma.hbm_to_vmem [thread:$0]  (!%p1845_p6), %s2315_s7, 128, %s1851_s23, [#allocation17]  }
  0x6c   : > { %s1135_s24 = sadd.s32 4294967294, %s1732_s14   ;;  %s45_s25 = sadd.s32 1, %s1728_s13 }
  0x6d   : > { %s54_s26 = sadd.s32 1, %s1720_s11  ;;  %p47_p7 = scmp.ge.s32.totalorder %s45_s25, 2 }
  0x6e   : > { %p61_p9 = scmp.ne.s32.totalorder %s1720_s11, %s1716_s10  ;;  %p62_p4 = scmp.eq.s32.totalorder %s1732_s14, 0 }
  0x6f   : > { %p67_p1 = scmp.ne.s32.totalorder %s1716_s10, %s1712_s30  ;;  %s2365_s25 = smov (%p47_p7, %s45_s25), 0 }
  0x70   : > { %2316 = sst [smem:[#allocation31_spill]] %s2365_s25  ;;  %p1933_p3 = por %p62_p4, %p61_p9 }
  0x71   : > { %p2318_p10 = scmp.eq.s32.totalorder %s1831_s15, 0  ;;  %s49_s28 = ssub.s32 %s1728_s13, %s2365_s25 }
  0x72   : > { %p280_p12 = scmp.eq.s32.totalorder %s1831_s15, 1  ;;  %p52_p13 = scmp.eq.s32.totalorder %s49_s28, 0 }
  0x73   : > { %p1939_p11 = por %p2318_p10, %p67_p1  ;;  %p286_p0 = scmp.eq.s32.totalorder %s1135_s24, 1 }
  0x74   : > { %p1946_p2 = por %p280_p12, %p61_p9  ;;  %p1300_p5 = scmp.lt.s32.totalorder %s1732_s14, 2 }
  0x75   : > { %s2319_s23 = scalar_select %p1939_p11, 1, 0 }
  0x76   : > { %s2321_s17 = scalar_select %p1946_p2, 1, 0 }
  0x77   : > { %2320 = sst [smem:[#allocation32_spill]] %s2319_s23  ;;  %p1954_p7 = por %p286_p0, %p67_p1 }
  0x78   : > { %2322 = sst [smem:[#allocation33_spill]] %s2321_s17  ;;  %s1959_s20 = sand.u32 1, %s1720_s11  }
  0x79   : > { %s1952_s19 = scalar_select %p52_p13, %s1720_s11, %s54_s26  }
  0x7a   : > { %s2324_s22 = scalar_select %p1954_p7, 1, 0 }
  0x7b   : > { %2323 = sst [smem:[#allocation34_spill]] %s1952_s19  ;;  %s2280_s18 = sshll.u32 %s1959_s20, 3 }
  0x7c   : > { %2325 = sst [smem:[#allocation35_spill]] %s2324_s22  ;;  %s2281_s9 = sshll.u32 %s1728_s13, 7 }
  0x7d   : > { %p1965_p4 = pnand %p1300_p5, %p1933_p3  ;;  %s2283_s28 = sand.u32 1, %s1732_s14  }
  0x7e   : > { %s2327_s1 = sld [smem:[#allocation36_spill]]  ;;  %s384_s7 = scalar_lea.vmem [#allocation7], %s2280_s18 }
  0x7f   : > { %s2326_s24 = scalar_select %p1965_p4, 1, 0 }
  0x80   : > { %s392_s25 = sshll.u32 %s384_s7, 4  ;;  %s1984_s19 = scalar_lea.sflag [#allocation8], %s2283_s28  ;;  %s1980_s25 = int_to_ptr.vmem [resolvable:$true] %s392_s25 }
  0x81   : > { %p1990_p1 = pneg %p1965_p4 }
  0x83   : > { %s2328_s4 = scalar_select %p1990_p1, 1, 0 }
  0x84   : > { %s1975_s5 = scalar_lea.hbm %s2327_s1, %s2281_s9  ;;  %s1459_s7 = scalar_lea.hbm %s2327_s1, 256 }
  0x85   : > { %s1454_s11 = scalar_lea.hbm %s1975_s5, 128  ;;  %p1460_p12 = scmp.lt.u32.totalorder %s1975_s5, %s2327_s1 }
  0x86   : > { %p1455_p9 = scmp.ne.s32.totalorder %s1975_s5, %s1454_s11  ;;  %p1461_p13 = scmp.lt.u32.totalorder %s1459_s7, %s1454_s11 }
  0x87   : > { %p1463_p5 = scmp.lt.u32.totalorder %s1454_s11, %s1975_s5 }
  0x88   : > { %p1457_p3 = pnand %p1990_p1, %p1455_p9  ;;  %p1462_p0 = por %p1461_p13, %p1460_p12 }
  0x8a   : > { %p1458_p10 = pneg %p1457_p3  ;;  %p1464_p7 = por %p1463_p5, %p1462_p0 }
  0x8c   : > { %p1465_p2 = pnand %p1464_p7, %p1458_p10 }
  0x8e   : > { %1468 = shalt.err (!%p1465_p2)
}
  0x8f   : > { %s1469_s28 = scalar_lea.vmem %s1980_s25, 128  ;;  %s1737_s18 = smov [#allocation7]  }
  0x90   : > { %p1470_p9 = scmp.ne.s32.totalorder %s1980_s25, %s1469_s28  ;;  %s1474_s26 = sshll.u32 %s1737_s18, 4  ;;  %s1475_s26 = int_to_ptr.vmem [resolvable:$false] %s1474_s26 }
  0x91   : > { %s1476_s9 = scalar_lea.vmem %s1475_s26, 256  ;;  %p1477_p6 = scmp.lt.s32.totalorder %s1980_s25, %s1475_s26 }
  0x92   : > { %p1472_p3 = pnand %p1470_p9, %p1990_p1  ;;  %p1478_p8 = scmp.lt.s32.totalorder %s1476_s9, %s1469_s28 }
  0x94   : > { %p1473_p11 = pneg %p1472_p3  ;;  %p1479_p12 = por %p1478_p8, %p1477_p6 }
  0x96   : > { %p1480_p13 = pnand %p1479_p12, %p1473_p11 }
  0x98   : > { %1483 = shalt.err (!%p1480_p13)
}
  0x99   : > { %1284 = dma.hbm_to_vmem [thread:$0]  (!%p1965_p4), %s1975_s5, 128, %s1980_s25, %s1984_s19  }
  0x9a   : > { %s2329_s27 = sshll.u32 %s1959_s20, 5  ;;  %s1738_s1 = smov [#allocation15]  }
  0x9b   : > { %s403_s7 = scalar_lea.vmem [#allocation9], %s2329_s27  ;;  %s2330_s28 = smov %s2329_s27 }
  0x9c   : > { %s411_s18 = sshll.u32 %s403_s7, 4  ;;  %s425_s26 = scalar_lea.vmem [#allocation10], %s2330_s28  ;;  %s2017_s18 = int_to_ptr.vmem [resolvable:$true] %s411_s18 }
  0x9d   : > { %s433_s9 = sshll.u32 %s425_s26, 4  ;;  %s328_s22 = sshll.u32 %s1738_s1, 4  ;;  %s2021_s9 = int_to_ptr.vmem [resolvable:$true] %s433_s9  ;;  %s329_s22 = int_to_ptr.vmem [resolvable:$true] %s328_s22 }
  0x9e   : > { %s1484_s12 = scalar_lea.hbm %s2271_s6, 128  ;;  %p2331_p8 = scmp.ne.s32.totalorder %s2313_s29, 0 }
  0x9f   : > { %p1485_p6 = scmp.ne.s32.totalorder %s2271_s6, %s1484_s12  ;;  %p1491_p7 = scmp.lt.u32.totalorder %s1484_s12, %s2271_s6 }
  0xa1   : > { %p1487_p11 = pnand %p1485_p6, %p2331_p8 }
  0xa3   : > { %p1488_p2 = pneg %p1487_p11 }
  0xa5   : > { %p1493_p10 = pnand %p1491_p7, %p1488_p2 }
  0xa7   : > { %1496 = shalt.err (!%p1493_p10)
}
  0xa8   : > { %s1497_s1 = scalar_lea.vmem %s329_s22, 128  ;;  %p1505_p3 = scmp.lt.s32.totalorder %s329_s22, %s329_s22 }
  0xa9   : > { %p1498_p0 = scmp.ne.s32.totalorder %s329_s22, %s1497_s1  ;;  %p1506_p12 = scmp.lt.s32.totalorder %s1497_s1, %s1497_s1 }
  0xab   : > { %p1500_p5 = pnand %p1498_p0, %p2331_p8  ;;  %p1507_p13 = por %p1506_p12, %p1505_p3 }
  0xad   : > { %p1501_p9 = pneg %p1500_p5 }
  0xaf   : > { %p1508_p4 = pnand %p1507_p13, %p1501_p9 }
  0xb1   : > { %1511 = shalt.err (!%p1508_p4)
}
  0xb2   : > { %p2332_p6 = scmp.ne.s32.totalorder %s2311_s21, 0  ;;  %s1739_s12 = smov [#allocation18]  }
  0xb3   : > { %s350_s17 = sshll.u32 %s1739_s12, 4  ;;  %s2333_s7 = sshll.u32 %s1728_s13, 7  ;;  %s351_s17 = int_to_ptr.vmem [resolvable:$true] %s350_s17 }
  0xb4   : > { %1271 = dma.hbm_to_vmem [thread:$0]  (!%p2332_p6), %s2271_s6, 128, %s329_s22, [#allocation14]  }
  0xb5   : > { %s2046_s5 = scalar_lea.hbm %s2265_s0, %s2333_s7  ;;  %s1512_s1 = scalar_lea.hbm %s2273_s8, 128 }
  0xb6   : > { %p1513_p4 = scmp.ne.s32.totalorder %s2273_s8, %s1512_s1  ;;  %p1519_p7 = scmp.lt.u32.totalorder %s1512_s1, %s2273_s8 }
  0xb8   : > { %p1515_p11 = pnand %p1513_p4, %p2331_p8 }
  0xba   : > { %p1516_p2 = pneg %p1515_p11 }
  0xbc   : > { %p1521_p10 = pnand %p1519_p7, %p1516_p2 }
  0xbe   : > { %1524 = shalt.err (!%p1521_p10)
}
  0xbf   : > { %s1525_s15 = scalar_lea.vmem %s351_s17, 128  ;;  %p1533_p3 = scmp.lt.s32.totalorder %s351_s17, %s351_s17 }
  0xc0   : > { %p1526_p0 = scmp.ne.s32.totalorder %s351_s17, %s1525_s15  ;;  %p1534_p12 = scmp.lt.s32.totalorder %s1525_s15, %s1525_s15 }
  0xc2   : > { %p1528_p5 = pnand %p1526_p0, %p2331_p8  ;;  %p1535_p13 = por %p1534_p12, %p1533_p3 }
  0xc4   : > { %p1529_p9 = pneg %p1528_p5 }
  0xc6   : > { %p1536_p1 = pnand %p1535_p13, %p1529_p9 }
  0xc8   : > { %1539 = shalt.err (!%p1536_p1)
}
  0xc9   : > { %1277 = dma.hbm_to_vmem [thread:$0]  (!%p2332_p6), %s2273_s8, 128, %s351_s17, [#allocation17]  }
  0xca   : > { %s2334_s29 = sshll.u32 %s1959_s20, 3  ;;  %s2335_s28 = sshll.u32 %s1728_s13, 9 }
  0xcb   : > { %s365_s12 = scalar_lea.vmem [#allocation4], %s2334_s29  ;;  %s2073_s21 = scalar_lea.hbm %s2267_s2, %s2335_s28 }
  0xcc   : > { %s373_s7 = sshll.u32 %s365_s12, 4  ;;  %s362_s27 = scalar_lea.sflag [#allocation5], %s1959_s20  ;;  %s374_s7 = int_to_ptr.vmem [resolvable:$true] %s373_s7 }
  0xcd   : > { %s1540_s1 = scalar_lea.hbm %s2046_s5, 128  ;;  %p2336_p8 = scmp.ne.s32.totalorder %s2328_s4, 0 }
  0xce   : > { %p1541_p1 = scmp.ne.s32.totalorder %s2046_s5, %s1540_s1  ;;  %s1545_s17 = scalar_lea.hbm %s2265_s0, 256 }
  0xcf   : > { %p1546_p6 = scmp.lt.u32.totalorder %s2046_s5, %s2265_s0  ;;  %p1547_p2 = scmp.lt.u32.totalorder %s1545_s17, %s1540_s1 }
  0xd0   : > { %p1543_p4 = pnand %p1541_p1, %p2336_p8  ;;  %p1549_p10 = scmp.lt.u32.totalorder %s1540_s1, %s2046_s5 }
  0xd1   : > { %p1548_p7 = por %p1547_p2, %p1546_p6 }
  0xd2   : > { %p1544_p11 = pneg %p1543_p4 }
  0xd3   : > { %p1550_p0 = por %p1549_p10, %p1548_p7 }
  0xd5   : > { %p1551_p5 = pnand %p1550_p0, %p1544_p11 }
  0xd7   : > { %1554 = shalt.err (!%p1551_p5)
}
  0xd8   : > { %s1555_s20 = scalar_lea.vmem %s374_s7, 128  ;;  %s1740_s11 = smov [#allocation4]  }
  0xd9   : > { %p1556_p9 = scmp.ne.s32.totalorder %s374_s7, %s1555_s20  ;;  %s1560_s29 = sshll.u32 %s1740_s11, 4  ;;  %s1561_s29 = int_to_ptr.vmem [resolvable:$false] %s1560_s29 }
  0xda   : > { %s1562_s12 = scalar_lea.vmem %s1561_s29, 256  ;;  %p1563_p13 = scmp.lt.s32.totalorder %s374_s7, %s1561_s29 }
  0xdb   : > { %p1558_p3 = pnand %p1556_p9, %p2336_p8  ;;  %p1564_p1 = scmp.lt.s32.totalorder %s1562_s12, %s1555_s20 }
  0xdd   : > { %p1559_p12 = pneg %p1558_p3  ;;  %p1565_p4 = por %p1564_p1, %p1563_p13 }
  0xdf   : > { %p1566_p2 = pnand %p1565_p4, %p1559_p12 }
  0xe1   : > { %1569 = shalt.err (!%p1566_p2)
}
  0xe2   : > { %p2337_p6 = scmp.ne.s32.totalorder %s2326_s24, 0  ;;  %s2098_s1 = scalar_lea.hbm %s2268_s3, %s2335_s28 }
  0xe3   : > { %s1570_s22 = scalar_lea.hbm %s2073_s21, 512  ;;  %s1575_s15 = scalar_lea.hbm %s2267_s2, 1024 }
  0xe4   : > { %1281 = dma.hbm_to_vmem [thread:$0]  (!%p2337_p6), %s2046_s5, 128, %s374_s7, %s362_s27  }
  0xe5   : > { %p1571_p11 = scmp.ne.s32.totalorder %s2073_s21, %s1570_s22  ;;  %p1576_p0 = scmp.lt.u32.totalorder %s2073_s21, %s2267_s2 }
  0xe6   : > { %p1577_p5 = scmp.lt.u32.totalorder %s1575_s15, %s1570_s22  ;;  %p1579_p3 = scmp.lt.u32.totalorder %s1570_s22, %s2073_s21 }
  0xe7   : > { %p1573_p7 = pnand %p1571_p11, %p2336_p8 }
  0xe8   : > { %p1578_p9 = por %p1577_p5, %p1576_p0 }
  0xe9   : > { %p1574_p10 = pneg %p1573_p7 }
  0xea   : > { %p1580_p12 = por %p1579_p3, %p1578_p9 }
  0xec   : > { %p1581_p13 = pnand %p1580_p12, %p1574_p10 }
  0xee   : > { %1584 = shalt.err (!%p1581_p13)
}
  0xef   : > { %s1585_s5 = scalar_lea.vmem %s2017_s18, 512  ;;  %s1741_s7 = smov [#allocation9]  }
  0xf0   : > { %p1586_p1 = scmp.ne.s32.totalorder %s2017_s18, %s1585_s5  ;;  %s1590_s27 = sshll.u32 %s1741_s7, 4  ;;  %s1591_s27 = int_to_ptr.vmem [resolvable:$false] %s1590_s27 }
  0xf1   : > { %s1592_s11 = scalar_lea.vmem %s1591_s27, 1024  ;;  %p1593_p11 = scmp.lt.s32.totalorder %s2017_s18, %s1591_s27 }
  0xf2   : > { %p1588_p4 = pnand %p1586_p1, %p2336_p8  ;;  %p1594_p7 = scmp.lt.s32.totalorder %s1592_s11, %s1585_s5 }
  0xf4   : > { %p1589_p2 = pneg %p1588_p4  ;;  %p1595_p0 = por %p1594_p7, %p1593_p11 }
  0xf6   : > { %p1596_p5 = pnand %p1595_p0, %p1589_p2 }
  0xf8   : > { %1599 = shalt.err (!%p1596_p5)
}
  0xf9   : > { %s1742_s29 = smov 128   ;;  %s1743_s12 = smov 8  }
  0xfa   : > { %1287 = dma.hbm_to_vmem [thread:$0]  (!%p2337_p6), %s2073_s21, 512, %s2017_s18, %s1984_s19, %s1742_s29, %s1742_s29, %s1743_s12  }
  0xfb   : > { %s2338_s28 = sand.u32 1, %s1732_s14   ;;  %s1600_s25 = scalar_lea.hbm %s2098_s1, 512 }
  0xfc   : > { %s2127_s26 = scalar_lea.sflag [#allocation11], %s2338_s28  ;;  %p1601_p10 = scmp.ne.s32.totalorder %s2098_s1, %s1600_s25 }
  0xfd   : > { %s1605_s17 = scalar_lea.hbm %s2268_s3, 1024  ;;  %p1606_p12 = scmp.lt.u32.totalorder %s2098_s1, %s2268_s3 }
  0xfe   : > { %p1603_p9 = pnand %p1601_p10, %p2336_p8  ;;  %p1607_p13 = scmp.lt.u32.totalorder %s1605_s17, %s1600_s25 }
  0xff   : > { %p1609_p4 = scmp.lt.u32.totalorder %s1600_s25, %s2098_s1 }
 0x100   : > { %p1604_p3 = pneg %p1603_p9  ;;  %p1608_p1 = por %p1607_p13, %p1606_p12 }
 0x102   : > { %p1610_p2 = por %p1609_p4, %p1608_p1 }
 0x104   : > { %p1611_p11 = pnand %p1610_p2, %p1604_p3 }
 0x106   : > { %1614 = shalt.err (!%p1611_p11)
}
 0x107   : > { %s1615_s19 = scalar_lea.vmem %s2021_s9, 512  ;;  %s1744_s18 = smov [#allocation10]  }
 0x108   : > { %p1616_p7 = scmp.ne.s32.totalorder %s2021_s9, %s1615_s19  ;;  %s1620_s21 = sshll.u32 %s1744_s18, 4  ;;  %s1621_s21 = int_to_ptr.vmem [resolvable:$false] %s1620_s21 }
 0x109   : > { %s1622_s20 = scalar_lea.vmem %s1621_s21, 1024  ;;  %p1623_p10 = scmp.lt.s32.totalorder %s2021_s9, %s1621_s21 }
 0x10a   : > { %p1618_p0 = pnand %p1616_p7, %p2336_p8  ;;  %p1624_p9 = scmp.lt.s32.totalorder %s1622_s20, %s1615_s19 }
 0x10c   : > { %p1619_p5 = pneg %p1618_p0  ;;  %p1625_p12 = por %p1624_p9, %p1623_p10 }
 0x10e   : > { %p1626_p13 = pnand %p1625_p12, %p1619_p5 }
 0x110   : > { %1629 = shalt.err (!%p1626_p13)
}
 0x111   : > { %1290 = dma.hbm_to_vmem [thread:$0]  (!%p2337_p6), %s2098_s1, 512, %s2021_s9, %s2127_s26, %s1742_s29, %s1742_s29, %s1743_s12  }
 0x112   : > { %p2339_p8 = scmp.ne.s32.totalorder %s2310_s16, 0 }
 0x113   : > { %s2340_s4 = sld [smem:[#allocation32_spill]] (!%p2339_p8)  ;;  %s2157_s5 = sand.u32 (!%p2339_p8), 1, %s1716_s10  }
 0x114   : > { %445 = sbr.rel (%p2339_p8) target bundleno = 857 (0x359), region = 56  ;;  %s2160_s7 = sshll.u32 (!%p2339_p8), %s2157_s5, 3 }
 0x115   : > { %s448_s24 = scalar_lea.sflag (!%p2339_p8), [#allocation5], %s2157_s5  ;;  %s451_s27 = scalar_lea.vmem (!%p2339_p8), [#allocation4], %s2160_s7 }
 0x119   : > { %p2341_p3 = scmp.ne.s32.totalorder (!%p2339_p8), %s2340_s4, 0 }
 0x11b   : > { %1683 = dma.done.wait (%p2341_p3), %s448_s24, 128  }
 0x11c   : > { %1685 = vsyncadd (%p2341_p3), %s448_s24, 4294967168  ;;  %s2342_s9 = sld [smem:[#allocation30_spill]]  ;;  %s460_s11 = scalar_lea.vmem [#allocation7], %s2160_s7 }
 0x122   : > { %s456_s16 = sand.u32 1, %s2342_s9  }
 0x123   : > { %s457_s1 = scalar_lea.sflag [#allocation8], %s456_s16 }
 0x124   : > { %1687 = dma.done.wait (%p2341_p3), %s457_s1, 640  }
 0x125   : > { %1689 = vsyncadd (%p2341_p3), %s457_s1, 4294966656  ;;  %s1156_s29 = sshll.u32 %s2157_s5, 5  ;;  %s475_s28 = scalar_lea.sflag [#allocation11], %s456_s16 }
 0x126   : > { %s469_s12 = scalar_lea.vmem [#allocation9], %s1156_s29  ;;  %s2175_s26 = scalar_lea.vmem [#allocation10], %s1156_s29 }
 0x127   : > { %1691 = dma.done.wait (%p2341_p3), %s475_s28, 512  }
 0x128   : > { %1693 = vsyncadd (%p2341_p3), %s475_s28, 4294966784  ;;  %p2343_p6 = scmp.eq.s32.totalorder %s2342_s9, 0 }
 0x12a   : > { %1695 = dma.done.wait (%p2343_p6), [#allocation11], 128   ;;  %p2344_p1 = pmov %p2343_p6 }
 0x12c   : > { %1697 = vsyncadd (%p2344_p1), [#allocation11], 4294967168  ;;  %p2345_p4 = pmov %p2344_p1 }
 0x12d   : > { %p2346_p2 = pmov %p2344_p1 }
 0x12e   : > { %1699 = dma.done.wait (%p2345_p4), [#allocation14], 256  }
 0x12f   : > { %1701 = vsyncadd (%p2346_p2), [#allocation14], 4294967040  ;;  %p2347_p11 = pmov %p2344_p1 }
 0x130   : > { %p2348_p7 = pmov %p2344_p1 }
 0x131   : > { %1703 = dma.done.wait (%p2347_p11), [#allocation17], 256  }
 0x132   : > { %1705 = vsyncadd (%p2348_p7), [#allocation17], 4294967040  ;;  %v1745_v0 = vmov 0.0|0.0   ;;  %v1746_v1 = vmov 0.0   ;;  %vm1747_vm0 = vmmov 0   ;;  %v1748_v2 = vmov 0  }
 0x133   : > { %1220 = vmatprep.subr.bf16.mxu0 %v1745_v0  ;;  %1199 = vmatprep.subr.mxu1 %v1746_v1  ;;  %vm629_vm1 = vcmask 64512   ;;  %v551_v3 = vld [vmem:[%s469_s12] sm:$0xff]  ;;  %v552_v4 = vld [vmem:[%s469_s12 + $0x8] sm:$0xff]  ;;  %v553_v7 = vld [vmem:[%s469_s12 + $0x10] sm:$0xff]  ;;  %vm555_vm2 = vcmask 261120   ;;  %vm869_vm3 = vcmask 7168   ;;  %v873_v28 = vlaneseq }
 0x134   : > { %1201 = vmatprep.mubr.msk.f32.mxu1 %vm1747_vm0, %v1746_v1  ;;  %1196 = vmatprep.mubr.msk.f32.mxu0 %vm1747_vm0, %v1746_v1  ;;  %v549_v5 = vld [vmem:[%s451_s27] sm:$0xff]  ;;  %v1221_v6 = vpack.c.bf16 %v552_v4, %v551_v3  ;;  %v554_v8 = vld [vmem:[%s469_s12 + $0x18] sm:$0xff]  ;;  %v708_v14 = vld [vmem:[%s2175_s26 + $0x10] sm:$0xff]  ;;  %870 = vst.msk [vmem:[#allocation2] sm:$0xff] %vm869_vm3, %v1746_v1  ;;  %s2349_s25 = sld [smem:[#allocation29_spill]]  ;;  %s2350_s22 = sld [smem:[#allocation33_spill]] }
 0x135   : > { %1366 = vset.pattern.permute.xlu0 %v1748_v2  ;;  %1367 = vset.pattern.permute.xlu1 %v1748_v2  ;;  %v548_v9 = vld [vmem:[#allocation12] sm:$0xff]  ;;  %v707_v11 = vld [vmem:[%s2175_s26 + $0x8] sm:$0xff]  ;;  %v1224_v12 = vpack.c.bf16 %v554_v8, %v553_v7  ;;  %v709_v15 = vld [vmem:[%s2175_s26 + $0x18] sm:$0xff]  ;;  %871 = vst.msk [vmem:[#allocation3] sm:$0xff] %vm869_vm3, %v1746_v1  ;;  %v874_v34 = vand.u32 127, %v873_v28  ;;  %s547_s17 = scalar_lea.vmem [#allocation19], %s2160_s7 }
 0x136   : > { %1200 = vmatpush3.msra.mxu1 %v549_v5  ;;  %v706_v10 = vld [vmem:[%s2175_s26] sm:$0xff]  ;;  %1222 = vmatpush3.bf16.msra.mxu0 %v1221_v6  ;;  %v1230_v17 = vpack.c.bf16 %v709_v15, %v708_v14  ;;  %v550_v18 = vld [vmem:[#allocation15] sm:$0xff]  ;;  %v705_v20 = vld [vmem:[#allocation16] sm:$0xff]  ;;  %s936_s15 = sshll.u32 %s547_s17, 4  ;;  %s2351_s18 = sld [smem:[#allocation40_spill]]  ;;  %s2218_s15 = int_to_ptr.vmem [resolvable:$true] %s936_s15 }
 0x137   : > { %1226 = vmatprep.subr.bf16.mxu1 %v1745_v0  ;;  %1202 = vmatmul.mubr.msk.f32.vlgmr.msra.gmra.mrb[0].mxu1 %vm629_vm1, %v548_v9  ;;  %v1227_v13 = vpack.c.bf16 %v707_v11, %v706_v10  ;;  %v857_v16 = vld [vmem:[#allocation18] sm:$0xff]  ;;  %v704_v19 = vld [vmem:[%s460_s11] sm:$0xff]  ;;  %v703_v21 = vld [vmem:[#allocation13] sm:$0xff]  ;;  %vm877_vm4 = vcmp.lt.s32.totalorder %v874_v34, 16  ;;  %s923_s20 = scalar_lea.sflag [#allocation6], %s2157_s5  ;;  %s1630_s4 = scalar_lea.vmem %s2218_s15, 128 }
 0x138   : > { %1212 = vmatprep.mubr.msk.f32.mxu1 %vm1747_vm0, %v1746_v1  ;;  %1223 = vmatprep.subr.bf16.mxu0 %v1745_v0  ;;  %p1631_p0 = scmp.ne.s32.totalorder %s2218_s15, %s1630_s4  ;;  %s1749_s7 = smov [#allocation19]  }
 0x139   : > { %1228 = vmatpush3.bf16.msra.mxu1 %v1227_v13  ;;  %860 = vperm.xlu0 %1366, %v857_v16   ;;  %s1634_s24 = sshll.u32 %s1749_s7, 4  ;;  %s1635_s24 = int_to_ptr.vmem [resolvable:$false] %s1634_s24 }
 0x13a   : > { %1229 = vmatprep.subr.bf16.mxu1 %v1745_v0  ;;  %1225 = vmatpush3.bf16.msra.mxu0 %v1224_v12  ;;  %s1169_s30 = sshll.u32 %s2349_s25, 7  ;;  %p2352_p5 = scmp.ne.s32.totalorder %s2350_s22, 0 }
 0x13b   : > { %1215 = vmatprep.subr.mxu0 %v1746_v1  ;;  %v881_v40 = vld [vmem:[#allocation2] sm:$0xff]  ;;  %s1636_s27 = scalar_lea.vmem %s1635_s24, 256  ;;  %p1637_p12 = scmp.lt.s32.totalorder %s2218_s15, %s1635_s24 }
 0x13c   : > { %v887_v42 = vld [vmem:[#allocation3] sm:$0xff]  ;;  %s2216_s21 = scalar_lea.hbm %s2351_s18, %s1169_s30  ;;  %p1632_p10 = pnand %p1631_p0, %p2352_p5 }
 0x13d   : > { %1231 = vmatpush3.bf16.msra.mxu1 %v1230_v17  ;;  %1197 = vmatmul.mubr.msk.f32.vlgmr.msra.gmra.mrb[0].mxu0 %vm555_vm2, %v550_v18  ;;  %p1638_p13 = scmp.lt.s32.totalorder %s1636_s27, %s1630_s4 }
 0x13e   : > { %1216 = vmatpush3.msra.mxu0 %v704_v19  ;;  %1217 = vmatprep.mubr.msk.f32.mxu0 %vm1747_vm0, %v1746_v1  ;;  %p1633_p9 = pneg %p1632_p10 }
 0x13f   : > { %p1639_p8 = por %p1638_p13, %p1637_p12 }
 0x140   : > { %1213 = vmatmul.mubr.msk.f32.vlgmr.msra.gmra.mrb[2].mxu1 %vm555_vm2, %v705_v20 }
 0x141   : > { %1218 = vmatmul.mubr.msk.f32.vlgmr.msra.gmra.mrb[2].mxu0 %vm629_vm1, %v703_v21  ;;  %p1640_p3 = pnand %p1639_p8, %p1633_p9 }
 0x1b8   : > { %v861_v33 = vpop.permute.xlu0 %860 }
 0x20a   : > { %v699_v22 = vpop.f32.mrb[0].mxu1 }
 0x20b   : > { %v1203_v23 = vpop.f32.mrb[1].mxu1 }
 0x210   : > { %v625_v24 = vpop.f32.mrb[0].mxu0 }
 0x211   : > { %v700_v25 = vadd.f32 %v699_v22, %v625_v24  ;;  %v1198_v26 = vpop.f32.mrb[1].mxu0 }
 0x213   : > { %v779_v27 = vpop.f32.mrb[2].mxu1 }
 0x214   : > { %v1214_v29 = vpop.f32.mrb[3].mxu1  ;;  %v852_v30 = vpop.f32.mrb[2].mxu0 }
 0x215   : > { %v853_v31 = vadd.f32 %v852_v30, %v779_v27  ;;  %v1219_v32 = vpop.f32.mrb[3].mxu0 }
 0x217   : > { %v856_v35 = vadd.f32 %v853_v31, %v700_v25 }
 0x219   : > { %v863_v36 = vadd.f32 %v861_v33, %v856_v35 }
 0x21b   : > { %v864_v37 = vmax.f32 %v863_v36, 0.0 }
 0x21d   : > { %v880_v38 = vsel %vm877_vm4, %v864_v37, 0.0 }
 0x21e   : > { %882 = vadd.xlane.f32.xlu0 %v880_v38  ;;  %v888_v39 = vmul.f32 %v880_v38, %v880_v38 }
 0x220   : > { %889 = vadd.xlane.f32.xlu1 %v888_v39 }
 0x2ab   : > { %v883_v41 = vpop.xlane.xlu0 %882 }
 0x2ac   : > { %v884_v43 = vadd.f32 %v883_v41, %v881_v40 }
 0x2ad   : > { %v890_v44 = vpop.xlane.xlu1 %889 }
 0x2ae   : > { %886 = vst.msk [vmem:[#allocation2] sm:$0xff] %vm869_vm3, %v884_v43  ;;  %v891_v45 = vadd.f32 %v890_v44, %v887_v42 }
 0x2b0   : > { %892 = vst.msk [vmem:[#allocation3] sm:$0xff] %vm869_vm3, %v891_v45 }
 0x2b5   : > { %v900_v46 = vld [vmem:[#allocation2] sm:$0xff] }
 0x2b6   : > { %v901_v47 = vmul.f32 0.0625, %v900_v46 }
 0x2b7   : > { %v902_v48 = vld [vmem:[#allocation3] sm:$0xff] }
 0x2b8   : > { %v904_v49 = vmul.f32 %v901_v47, %v901_v47  ;;  %909 = vperm.xlu1 %1367, %v901_v47   ;;  %v903_v50 = vmul.f32 0.0625, %v902_v48 }
 0x2ba   : > { %v905_v51 = vsub.f32 %v903_v50, %v904_v49 }
 0x2bc   : > { %v913_v52 = vadd.f32 1e-05, %v905_v51 }
 0x2be   : > { %1368 = vrsqrt.f32 %v913_v52 }
 0x2c8   : > { %v1369_v53 = vpop.eup %1368 }
 0x2c9   : > { %917 = vperm.xlu1 %1367, %v1369_v53  }
 0x337   : > { %v910_v54 = vpop.permute.xlu1 %909 }
 0x338   : > { %v912_v55 = vsub.f32 %v864_v37, %v910_v54 }
 0x348   : > { %v918_v56 = vpop.permute.xlu1 %917 }
 0x349   : > { %v920_v57 = vmul.f32 %v918_v56, %v912_v55 }
 0x34b   : > { %921 = vst [vmem:[%s547_s17] sm:$0xff] %v920_v57 }
 0x34c   : > { %1643 = shalt.err (!%p1640_p3)
}
 0x34d   : > { %s1644_s5 = scalar_lea.hbm %s2216_s21, 128  ;;  %s1648_s1 = scalar_lea.hbm %s2351_s18, 256 }
 0x34e   : > { %p1645_p6 = scmp.ne.s32.totalorder %s2216_s21, %s1644_s5  ;;  %p1649_p2 = scmp.lt.u32.totalorder %s2216_s21, %s2351_s18 }
 0x34f   : > { %p1650_p11 = scmp.lt.u32.totalorder %s1648_s1, %s1644_s5  ;;  %p1652_p0 = scmp.lt.u32.totalorder %s1644_s5, %s2216_s21 }
 0x350   : > { %p1646_p1 = pnand %p1645_p6, %p2352_p5 }
 0x351   : > { %p1651_p7 = por %p1650_p11, %p1649_p2 }
 0x352   : > { %p1647_p4 = pneg %p1646_p1 }
 0x353   : > { %p1653_p10 = por %p1652_p0, %p1651_p7 }
 0x355   : > { %p1654_p9 = pnand %p1653_p10, %p1647_p4 }
 0x357   : > { %1657 = shalt.err (!%p1654_p9)
}
 0x358   : > { %1260 = dma.vmem_to_hbm [thread:$0]  (%p2352_p5), %s2218_s15, 128, %s2216_s21, %s923_s20  }
 0x359 PF: > { %s2353_s12 = sld [smem:[#allocation27_spill]]  ;;  %s2354_s28 = sld [smem:[#allocation35_spill]] }
 0x35a   : > { %p2356_p13 = scmp.ge.s32.totalorder %s1732_s14, 2 }
 0x35f   : > { %s948_s26 = sand.u32 1, %s2353_s12   ;;  %p2355_p12 = scmp.ne.s32.totalorder %s2354_s28, 0 }
 0x360   : > { %s949_s25 = scalar_lea.sflag [#allocation6], %s948_s26 }
 0x361   : > { %p1292_p8 = pnand %p2356_p13, %p2355_p12 }
 0x363   : > { %1707 = dma.done.wait (!%p1292_p8), %s949_s25, 128  }
 0x364   : > { %1709 = vsyncadd (!%p1292_p8), %s949_s25, 4294967168  ;;  %s33_s14 = sadd.s32 1, %s1732_s14   ;;  %s2357_s17 = sld [smem:[#allocation28_spill]] }
 0x365   : > { %p30_p3 = scmp.ge.s32.totalorder %s33_s14, 4   ;;  %s2358_s11 = sld [smem:[#allocation34_spill]] }
 0x366   : > { %s2359_s22 = sld [smem:[#allocation31_spill]]  ;;  %s2360_s30 = smov %s1716_s10 }
 0x367   : > { %s2362_s12 = smov %s1728_s13  ;;  %32 = sbr.rel (!%p30_p3) target bundleno = 18 (0x12), region = 167 }
 0x36a   : > { %s2361_s10 = smov %s2357_s17 }
 0x36c   : > { %s2363_s13 = smov %s2359_s22 }
 0x36e   :  { %954 = vsyncpa [#allocation5], 1 }
 0x36f   :  { %956 = vsyncpa [#allocation5 + $0x1], 1 }
 0x370   :  { %957 = vsyncpa [#allocation8], 1 }
 0x371   :  { %959 = vsyncpa [#allocation8 + $0x1], 1 }
 0x372   :  { %960 = vsyncpa [#allocation11], 1 }
 0x373   :  { %962 = vsyncpa [#allocation11 + $0x1], 1 }
 0x374   :  { %963 = vsyncpa [#allocation14], 1 }
 0x375   :  { %964 = vsyncpa [#allocation17], 1 }
 0x376   :  { %965 = vsyncpa [#allocation6], 1 }
 0x377   :  { %967 = vsyncpa [#allocation6 + $0x1], 1 }

</bundles_post_ra>
